<compile_context>
chip_gen: v6e
topology: v6e:2x2x1
jax: 0.10.0
libtpu: 0.0.40
codegen_flags: <defaults>
</compile_context>

<pallas_src>
import math
from functools import partial

import jax
import jax.numpy as jnp
from jax.experimental import pallas as pl
from jax.experimental.pallas import tpu as pltpu

_INV_SQRT_2PI = 1.0 / math.sqrt(2.0 * math.pi)
_LOG3 = math.log(3.0)


def _layernorm(x, gamma, beta, eps=1e-5):
    mu = jnp.mean(x, axis=-1, keepdims=True)
    var = jnp.mean((x - mu) ** 2, axis=-1, keepdims=True)
    return (x - mu) * jax.lax.rsqrt(var + eps) * gamma + beta


def _gelu_exact(x):
    # matches torch.nn.functional.gelu (erf-based, non-approximate)
    return 0.5 * x * (1.0 + jax.lax.erf(x / jnp.float32(math.sqrt(2.0))))


def encoder_layer_kernel(
    x_ref,
    wq_ref, bq_ref, wk_ref, bk_ref, wv_ref, bv_ref,
    wsig_ref, bsig_ref, wo_ref, bo_ref,
    g_attn_ref, be_attn_ref,
    w1_ref, b1_ref, w2_ref, b2_ref,
    g_out_ref, be_out_ref,
    out_ref, series_ref, prior_ref,
    k_scr, v_scr,
    *, n_heads, d_k, d_v, tq,
):
    H = n_heads
    bf16 = jnp.bfloat16
    L, D = x_ref.shape[1], x_ref.shape[2]
    qi = pl.program_id(1)

    # ---- K/V projections: hoisted, computed once per batch window (qi == 0) ----------
    # One lane-dense matmul each over the full window, stored head-major in bf16 scratch
    # that persists across all query tiles of this batch element.
    @pl.when(qi == 0)
    def _():
        xf_b = x_ref[0].astype(bf16)                                        # (L, D)
        k = jnp.dot(xf_b, wk_ref[...], preferred_element_type=jnp.float32) + bk_ref[...]
        v = jnp.dot(xf_b, wv_ref[...], preferred_element_type=jnp.float32) + bv_ref[...]
        k_scr[...] = jnp.transpose(k.reshape(L, H, d_k), (1, 0, 2)).astype(bf16)  # (H, L, d_k)
        v_scr[...] = jnp.transpose(v.reshape(L, H, d_v), (1, 0, 2)).astype(bf16)  # (H, L, d_v)

    # ---- this query tile (queries / sigma / residual / FFN only touch tq rows) --------
    q_start = pl.multiple_of(qi * tq, tq)
    xq = x_ref[0, pl.ds(q_start, tq), :]                                    # (tq, D) fp32

    # ---- query projection: one lane-dense matmul, then head-major reform --------------
    q = jnp.dot(xq.astype(bf16), wq_ref[...],
                preferred_element_type=jnp.float32) + bq_ref[...]           # (tq, H*d_k)
    q = q * jnp.float32(1.0 / math.sqrt(d_k))                               # fold 1/sqrt(d_k)
    q3 = jnp.transpose(q.reshape(tq, H, d_k), (1, 0, 2)).astype(bf16)       # (H, tq, d_k)

    # ---- attention "series": scaled softmax over keys ---------------------------------
    scores = jnp.einsum('hqk,hsk->hqs', q3, k_scr[...],
                        preferred_element_type=jnp.float32)                 # (H, tq, L)
    scores = scores - jnp.max(scores, axis=-1, keepdims=True)
    e = jnp.exp(scores)
    inv_den = pl.reciprocal(jnp.sum(e, axis=-1, keepdims=True), approx=True)
    series = e * inv_den                                                    # (H, tq, L)
    series_ref[0] = series.astype(series_ref.dtype)

    # ---- Gaussian "prior": |i-j| generated in-kernel, sigma kept fp32 -----------------
    ri = jax.lax.broadcasted_iota(jnp.int32, (tq, L), 0) + qi * tq
    ci = jax.lax.broadcasted_iota(jnp.int32, (tq, L), 1)
    dist = (ri - ci).astype(jnp.float32)                                    # (tq, L)
    neg_half_d2 = dist * dist * jnp.float32(-0.5)                           # shared by all heads

    sig = jnp.einsum('hd,qd->hq', wsig_ref[...], xq,
                     preferred_element_type=jnp.float32) + bsig_ref[...]    # (H, tq)
    sig = jax.nn.sigmoid(sig * 5.0) + 1e-5
    sig = jnp.exp(sig * jnp.float32(_LOG3)) - 1.0                           # 3**sig - 1
    inv_sig = (1.0 / sig)[:, :, None]                                       # exact reciprocal
    prior = (jnp.float32(_INV_SQRT_2PI) * inv_sig) * jnp.exp(
        neg_half_d2[None, :, :] * (inv_sig * inv_sig))                      # (H, tq, L)
    prior_ref[0] = prior.astype(prior_ref.dtype)

    # ---- context first, then ONE lane-dense output projection -------------------------
    ctx_h = jnp.einsum('hqs,hsv->hqv', series.astype(bf16), v_scr[...],
                       preferred_element_type=jnp.float32)                  # (H, tq, d_v)
    ctx = jnp.transpose(ctx_h, (1, 0, 2)).reshape(tq, H * d_v)              # (tq, H*d_v)
    attn_delta = jnp.dot(ctx.astype(bf16), wo_ref[...],
                         preferred_element_type=jnp.float32) + bo_ref[...]  # (tq, D)

    attn = _layernorm(xq + attn_delta, g_attn_ref[...], be_attn_ref[...])

    # ---- feed-forward (conv1d k=1 == matmul over the feature axis) --------------------
    h1 = jnp.dot(attn.astype(bf16), w1_ref[...],
                 preferred_element_type=jnp.float32) + b1_ref[...]
    h1 = _gelu_exact(h1)
    h2 = jnp.dot(h1.astype(bf16), w2_ref[...],
                 preferred_element_type=jnp.float32) + b2_ref[...]

    out_ref[0] = _layernorm(attn + h2, g_out_ref[...], be_out_ref[...]).astype(out_ref.dtype)


def _vmem_limit_bytes(L, D, H, d_k, d_v, d_ff, tq):
    f32, bf16 = 4, 2
    # pipeline buffers: x window + out tile + series/prior tiles (double-buffered)
    io = 2 * (L * D * f32 + tq * D * f32 + 2 * H * tq * L * f32)
    # grid-invariant weights/biases (count two buffers to stay conservative)
    weights = 2 * ((D * H * (2 * d_k + d_v) + H * d_v * D + 2 * D * d_ff) * bf16
                   + (H * D + 2 * H * d_k + H * d_v + 2 * H + 6 * D + d_ff) * f32)
    # persistent head-major K/V scratch (bf16)
    scratch = H * L * (d_k + d_v) * bf16
    # rough bound on live in-kernel intermediates
    live = (L * H * (d_k + d_v) * f32                    # fp32 k/v at qi == 0
            + 4 * H * tq * L * f32                       # scores / exp / series / prior
            + (tq * H * d_v + 2 * tq * d_ff + 6 * tq * D) * f32)
    est = io + weights + scratch + live
    try:
        phys = pltpu.get_tpu_info().vmem_capacity_bytes  # 64 MiB on v7x, 128 MiB on v5e/v6e
    except Exception:
        phys = 64 * 1024 * 1024
    cap = (phys * 3) // 4
    return int(min(max(est + est // 2, 32 * 1024 * 1024), cap))


def encoder_layer(x, params, *, n_heads, d_k, d_v, tq=None):
    B, L, D = x.shape
    H = n_heads
    d_ff = params["w1"].shape[1]
    if tq is None:
        tq = min(L, 128)
    assert L % tq == 0, "windows_size must be divisible by the query-tile size"
    n_qt = L // tq

    bf16 = jnp.bfloat16
    # Stacked (lane-dense) weights; only sigma's weight is transposed so its tiny matmul
    # produces the head-major (H, tq) result directly.  All matmul weights are bf16.
    operands = [
        params["wq"].astype(bf16), params["bq"],
        params["wk"].astype(bf16), params["bk"],
        params["wv"].astype(bf16), params["bv"],
        jnp.transpose(params["wsig"]), params["bsig"].reshape(H, 1),
        params["wo"].astype(bf16), params["bo"],
        params["g_attn"], params["be_attn"],
        params["w1"].astype(bf16), params["b1"],
        params["w2"].astype(bf16), params["b2"],
        params["g_out"], params["be_out"],
    ]

    # Grid-invariant operands: constant index_map, so the pipeline never re-DMAs them.
    def const_spec(a):
        nd = a.ndim
        return pl.BlockSpec(a.shape, lambda b, qi, _nd=nd: (0,) * _nd)

    in_specs = [
        pl.BlockSpec((1, L, D), lambda b, qi: (b, 0, 0)),   # x: full window (K/V + Q tile slice)
    ] + [const_spec(a) for a in operands]

    out_shapes = (
        jax.ShapeDtypeStruct((B, L, D), jnp.float32),
        jax.ShapeDtypeStruct((B, H, L, L), jnp.float32),
        jax.ShapeDtypeStruct((B, H, L, L), jnp.float32),
    )
    out_specs = (
        pl.BlockSpec((1, tq, D), lambda b, qi: (b, qi, 0)),
        pl.BlockSpec((1, H, tq, L), lambda b, qi: (b, 0, qi, 0)),
        pl.BlockSpec((1, H, tq, L), lambda b, qi: (b, 0, qi, 0)),
    )

    kernel = partial(encoder_layer_kernel, n_heads=H, d_k=d_k, d_v=d_v, tq=tq)
    return pl.pallas_call(
        kernel,
        out_shape=out_shapes,
        grid_spec=pltpu.PrefetchScalarGridSpec(
            num_scalar_prefetch=0,
            grid=(B, n_qt),                       # qi innermost: K/V scratch reused across tiles
            in_specs=in_specs,
            out_specs=out_specs,
            scratch_shapes=[
                pltpu.VMEM((H, L, d_k), jnp.bfloat16),    # persistent K (head-major)
                pltpu.VMEM((H, L, d_v), jnp.bfloat16),    # persistent V (head-major)
            ],
        ),
        compiler_params=pltpu.CompilerParams(
            dimension_semantics=("parallel", "arbitrary"),
            vmem_limit_bytes=_vmem_limit_bytes(L, D, H, d_k, d_v, d_ff, tq),
        ),
    )(x, *operands)


# ----------------------------- pure-JAX reference -----------------------------
def reference(x, p, dist, *, n_heads, d_k, d_v):
    B, L, D = x.shape
    q = x @ p["wq"] + p["bq"][0]
    k = x @ p["wk"] + p["bk"][0]
    v = x @ p["wv"] + p["bv"][0]
    sigma = x @ p["wsig"] + p["bsig"][0]                       # (B, L, H)
    q = q.reshape(B, L, n_heads, d_k)
    k = k.reshape(B, L, n_heads, d_k)
    v = v.reshape(B, L, n_heads, d_v)
    scores = jnp.einsum("blhe,bshe->bhls", q, k) / math.sqrt(d_k)
    series = jax.nn.softmax(scores, axis=-1)
    sig = jnp.transpose(sigma, (0, 2, 1))                      # (B, H, L)
    sig = jax.nn.sigmoid(sig * 5.0) + 1e-5
    sig = 3.0 ** sig - 1.0
    sig = sig[..., None]                                       # (B, H, L, 1)
    prior = (1.0 / (math.sqrt(2.0 * math.pi) * sig)) * jnp.exp(
        -(dist[None, None] ** 2) / (2.0 * sig ** 2))
    ctx = jnp.einsum("bhls,bshd->blhd", series, v).reshape(B, L, n_heads * d_v)
    attn = ctx @ p["wo"] + p["bo"][0]
    attn = _layernorm(x + attn, p["g_attn"][0], p["be_attn"][0])
    h1 = _gelu_exact(attn @ p["w1"] + p["b1"][0])
    h2 = h1 @ p["w2"] + p["b2"][0]
    out = _layernorm(attn + h2, p["g_out"][0], p["be_out"][0])
    return out, series, prior


def _make_params(key, d_model, d_ff, n_heads, d_k, d_v, scale):
    ks = jax.random.split(key, 12)

    def init(k, shape):
        return (scale * jax.random.normal(k, shape)).astype(jnp.float32)

    return {
        "wq": init(ks[0], (d_model, n_heads * d_k)),
        "bq": init(ks[1], (1, n_heads * d_k)),
        "wk": init(ks[2], (d_model, n_heads * d_k)),
        "bk": init(ks[3], (1, n_heads * d_k)),
        "wv": init(ks[4], (d_model, n_heads * d_v)),
        "bv": init(ks[5], (1, n_heads * d_v)),
        "wsig": init(ks[6], (d_model, n_heads)),
        "bsig": init(ks[7], (1, n_heads)),
        "wo": init(ks[8], (n_heads * d_v, d_model)),
        "bo": init(ks[9], (1, d_model)),
        "g_attn": jnp.ones((1, d_model), jnp.float32),
        "be_attn": jnp.zeros((1, d_model), jnp.float32),
        "w1": init(ks[10], (d_model, d_ff)),      # conv1 (k=1): d_model -> d_ff
        "b1": jnp.zeros((1, d_ff), jnp.float32),
        "w2": init(ks[11], (d_ff, d_model)),      # conv2 (k=1): d_ff -> d_model
        "b2": jnp.zeros((1, d_model), jnp.float32),
        "g_out": jnp.ones((1, d_model), jnp.float32),
        "be_out": jnp.zeros((1, d_model), jnp.float32),
    }


def _check(*, B, L, d_model, d_ff, n_heads, d_k, d_v, scale, out_tol, map_tol, seed):
    params = _make_params(jax.random.PRNGKey(seed), d_model, d_ff, n_heads, d_k, d_v, scale)
    x = jax.random.normal(jax.random.PRNGKey(seed + 1), (B, L, d_model), jnp.float32)

    out, series, prior = encoder_layer(x, params, n_heads=n_heads, d_k=d_k, d_v=d_v)
    jax.block_until_ready((out, series, prior))

    idx = jnp.arange(L, dtype=jnp.float32)
    dist = jnp.abs(idx[:, None] - idx[None, :])
    ro, rs, rp = reference(x, params, dist, n_heads=n_heads, d_k=d_k, d_v=d_v)

    assert out.shape == (B, L, d_model)
    assert series.shape == (B, n_heads, L, L) and prior.shape == (B, n_heads, L, L)
    # bf16 matmul inputs -> slightly loosened tolerance on the final output
    assert jnp.allclose(out, ro, atol=out_tol, rtol=out_tol), "out mismatch"
    assert jnp.allclose(series, rs, atol=map_tol, rtol=map_tol), "series mismatch"
    assert jnp.allclose(prior, rp, atol=map_tol, rtol=map_tol), "prior mismatch"


if __name__ == "__main__":
    # Small shapes: quick correctness check (single query tile).
    _check(B=2, L=8, d_model=32, d_ff=64, n_heads=4, d_k=8, d_v=8,
           scale=0.1, out_tol=3e-2, map_tol=2e-2, seed=0)
    # Larger shapes: exercises the multi-tile grid, the hoisted K/V scratch path and the
    # lane-dense merged projections with realistic (>= (8,128)) tile layouts.
    _check(B=2, L=256, d_model=128, d_ff=256, n_heads=4, d_k=32, d_v=32,
           scale=0.05, out_tol=5e-2, map_tol=2e-2, seed=2)
    print("KERNEL_OK")
</pallas_src>

<mosaic_0001>
module attributes {stable_mosaic.version = 11 : i64} {
  func.func @encoder_layer_kernel(%arg0: i32, %arg1: i32, %arg2: memref<1x8x32xf32, #tpu.memory_space<vmem>>, %arg3: memref<32x32xbf16, #tpu.memory_space<vmem>>, %arg4: memref<1x32xf32, #tpu.memory_space<vmem>>, %arg5: memref<32x32xbf16, #tpu.memory_space<vmem>>, %arg6: memref<1x32xf32, #tpu.memory_space<vmem>>, %arg7: memref<32x32xbf16, #tpu.memory_space<vmem>>, %arg8: memref<1x32xf32, #tpu.memory_space<vmem>>, %arg9: memref<4x32xf32, #tpu.memory_space<vmem>>, %arg10: memref<4x1xf32, #tpu.memory_space<vmem>>, %arg11: memref<32x32xbf16, #tpu.memory_space<vmem>>, %arg12: memref<1x32xf32, #tpu.memory_space<vmem>>, %arg13: memref<1x32xf32, #tpu.memory_space<vmem>>, %arg14: memref<1x32xf32, #tpu.memory_space<vmem>>, %arg15: memref<32x64xbf16, #tpu.memory_space<vmem>>, %arg16: memref<1x64xf32, #tpu.memory_space<vmem>>, %arg17: memref<64x32xbf16, #tpu.memory_space<vmem>>, %arg18: memref<1x32xf32, #tpu.memory_space<vmem>>, %arg19: memref<1x32xf32, #tpu.memory_space<vmem>>, %arg20: memref<1x32xf32, #tpu.memory_space<vmem>>, %arg21: memref<1x8x32xf32, #tpu.memory_space<vmem>>, %arg22: memref<1x4x8x8xf32, #tpu.memory_space<vmem>>, %arg23: memref<1x4x8x8xf32, #tpu.memory_space<vmem>>, %arg24: memref<4x8x8xbf16, #tpu.memory_space<vmem>>, %arg25: memref<4x8x8xbf16, #tpu.memory_space<vmem>>) attributes {dimension_semantics = [#tpu.dimension_semantics<parallel>, #tpu.dimension_semantics<arbitrary>], iteration_bounds = array<i64: 2, 1>, scalar_prefetch = 0 : i64, scratch_operands = 2 : i64, tpu.core_type = #tpu.core_type<tc>, window_params = [{transform_indices = @transform_0, window_bounds = array<i64: 1, 8, 32>}, {pipeline_mode = #tpu.pipeline_mode<synchronous>, transform_indices = @transform_1, window_bounds = array<i64: 32, 32>}, {pipeline_mode = #tpu.pipeline_mode<synchronous>, transform_indices = @transform_2, window_bounds = array<i64: 1, 32>}, {pipeline_mode = #tpu.pipeline_mode<synchronous>, transform_indices = @transform_3, window_bounds = array<i64: 32, 32>}, {pipeline_mode = #tpu.pipeline_mode<synchronous>, transform_indices = @transform_4, window_bounds = array<i64: 1, 32>}, {pipeline_mode = #tpu.pipeline_mode<synchronous>, transform_indices = @transform_5, window_bounds = array<i64: 32, 32>}, {pipeline_mode = #tpu.pipeline_mode<synchronous>, transform_indices = @transform_6, window_bounds = array<i64: 1, 32>}, {pipeline_mode = #tpu.pipeline_mode<synchronous>, transform_indices = @transform_7, window_bounds = array<i64: 4, 32>}, {pipeline_mode = #tpu.pipeline_mode<synchronous>, transform_indices = @transform_8, window_bounds = array<i64: 4, 1>}, {pipeline_mode = #tpu.pipeline_mode<synchronous>, transform_indices = @transform_9, window_bounds = array<i64: 32, 32>}, {pipeline_mode = #tpu.pipeline_mode<synchronous>, transform_indices = @transform_10, window_bounds = array<i64: 1, 32>}, {pipeline_mode = #tpu.pipeline_mode<synchronous>, transform_indices = @transform_11, window_bounds = array<i64: 1, 32>}, {pipeline_mode = #tpu.pipeline_mode<synchronous>, transform_indices = @transform_12, window_bounds = array<i64: 1, 32>}, {pipeline_mode = #tpu.pipeline_mode<synchronous>, transform_indices = @transform_13, window_bounds = array<i64: 32, 64>}, {pipeline_mode = #tpu.pipeline_mode<synchronous>, transform_indices = @transform_14, window_bounds = array<i64: 1, 64>}, {pipeline_mode = #tpu.pipeline_mode<synchronous>, transform_indices = @transform_15, window_bounds = array<i64: 64, 32>}, {pipeline_mode = #tpu.pipeline_mode<synchronous>, transform_indices = @transform_16, window_bounds = array<i64: 1, 32>}, {pipeline_mode = #tpu.pipeline_mode<synchronous>, transform_indices = @transform_17, window_bounds = array<i64: 1, 32>}, {pipeline_mode = #tpu.pipeline_mode<synchronous>, transform_indices = @transform_18, window_bounds = array<i64: 1, 32>}, {transform_indices = @transform_19, window_bounds = array<i64: 1, 8, 32>}, {transform_indices = @transform_20, window_bounds = array<i64: 1, 4, 8, 8>}, {transform_indices = @transform_21, window_bounds = array<i64: 1, 4, 8, 8>}]} {
    %c0_i32 = arith.constant 0 : i32
    %0 = arith.cmpi eq, %arg1, %c0_i32 : i32
    %1 = arith.extui %0 : i1 to i32
    %c0_i32_0 = arith.constant 0 : i32
    %2 = arith.cmpi ne, %1, %c0_i32_0 : i32
    scf.if %2 {
      %c0_78 = arith.constant 0 : index
      %c0_79 = arith.constant 0 : index
      %c0_80 = arith.constant 0 : index
      %163 = vector.load %arg2[%c0_78, %c0_79, %c0_80] : memref<1x8x32xf32, #tpu.memory_space<vmem>>, vector<1x8x32xf32>
      %164 = vector.shape_cast %163 : vector<1x8x32xf32> to vector<8x32xf32>
      %165 = arith.truncf %164 : vector<8x32xf32> to vector<8x32xbf16>
      %c0_81 = arith.constant 0 : index
      %c0_82 = arith.constant 0 : index
      %166 = vector.load %arg5[%c0_81, %c0_82] : memref<32x32xbf16, #tpu.memory_space<vmem>>, vector<32x32xbf16>
      %cst_83 = arith.constant dense<0.000000e+00> : vector<8x32xf32>
      %167 = tpu.matmul %165, %166, %cst_83 {dimension_numbers = #tpu.dot_dimension_numbers<[1], [0], [0], [1], [0, 0, 1, 1], [], []>} : vector<8x32xbf16>, vector<32x32xbf16>, vector<8x32xf32> -> vector<8x32xf32>
      %c0_84 = arith.constant 0 : index
      %c0_85 = arith.constant 0 : index
      %168 = vector.load %arg6[%c0_84, %c0_85] : memref<1x32xf32, #tpu.memory_space<vmem>>, vector<1x32xf32>
      %169 = vector.broadcast %168 : vector<1x32xf32> to vector<8x32xf32>
      %170 = arith.addf %167, %169 : vector<8x32xf32>
      %c0_86 = arith.constant 0 : index
      %c0_87 = arith.constant 0 : index
      %171 = vector.load %arg7[%c0_86, %c0_87] : memref<32x32xbf16, #tpu.memory_space<vmem>>, vector<32x32xbf16>
      %cst_88 = arith.constant dense<0.000000e+00> : vector<8x32xf32>
      %172 = tpu.matmul %165, %171, %cst_88 {dimension_numbers = #tpu.dot_dimension_numbers<[1], [0], [0], [1], [0, 0, 1, 1], [], []>} : vector<8x32xbf16>, vector<32x32xbf16>, vector<8x32xf32> -> vector<8x32xf32>
      %c0_89 = arith.constant 0 : index
      %c0_90 = arith.constant 0 : index
      %173 = vector.load %arg8[%c0_89, %c0_90] : memref<1x32xf32, #tpu.memory_space<vmem>>, vector<1x32xf32>
      %174 = vector.broadcast %173 : vector<1x32xf32> to vector<8x32xf32>
      %175 = arith.addf %172, %174 : vector<8x32xf32>
      %176 = vector.shape_cast %170 : vector<8x32xf32> to vector<8x4x8xf32>
      %177 = tpu.transpose %176, [1, 0, 2] : vector<8x4x8xf32> -> vector<4x8x8xf32>
      %178 = arith.truncf %177 : vector<4x8x8xf32> to vector<4x8x8xbf16>
      %c0_91 = arith.constant 0 : index
      %c0_92 = arith.constant 0 : index
      %c0_93 = arith.constant 0 : index
      %179 = vector.load %arg24[%c0_91, %c0_92, %c0_93] : memref<4x8x8xbf16, #tpu.memory_space<vmem>>, vector<4x8x8xbf16>
      tpu.vector_store %arg24[%c0_91, %c0_92, %c0_93], %178 {strides = array<i32>} : memref<4x8x8xbf16, #tpu.memory_space<vmem>>, vector<4x8x8xbf16>,
      %180 = vector.shape_cast %175 : vector<8x32xf32> to vector<8x4x8xf32>
      %181 = tpu.transpose %180, [1, 0, 2] : vector<8x4x8xf32> -> vector<4x8x8xf32>
      %182 = arith.truncf %181 : vector<4x8x8xf32> to vector<4x8x8xbf16>
      %c0_94 = arith.constant 0 : index
      %c0_95 = arith.constant 0 : index
      %c0_96 = arith.constant 0 : index
      %183 = vector.load %arg25[%c0_94, %c0_95, %c0_96] : memref<4x8x8xbf16, #tpu.memory_space<vmem>>, vector<4x8x8xbf16>
      tpu.vector_store %arg25[%c0_94, %c0_95, %c0_96], %182 {strides = array<i32>} : memref<4x8x8xbf16, #tpu.memory_space<vmem>>, vector<4x8x8xbf16>,
    } else {
    }
    %c8_i32 = arith.constant 8 : i32
    %3 = arith.muli %arg1, %c8_i32 : i32
    %4 = tpu.assume_multiple %3, 8 : i32
    %c0 = arith.constant 0 : index
    %5 = arith.index_cast %4 : i32 to index
    %c0_1 = arith.constant 0 : index
    %6 = vector.load %arg2[%c0, %5, %c0_1] : memref<1x8x32xf32, #tpu.memory_space<vmem>>, vector<1x8x32xf32>
    %7 = vector.shape_cast %6 : vector<1x8x32xf32> to vector<8x32xf32>
    %8 = arith.truncf %7 : vector<8x32xf32> to vector<8x32xbf16>
    %c0_2 = arith.constant 0 : index
    %c0_3 = arith.constant 0 : index
    %9 = vector.load %arg3[%c0_2, %c0_3] : memref<32x32xbf16, #tpu.memory_space<vmem>>, vector<32x32xbf16>
    %cst = arith.constant dense<0.000000e+00> : vector<8x32xf32>
    %10 = tpu.matmul %8, %9, %cst {dimension_numbers = #tpu.dot_dimension_numbers<[1], [0], [0], [1], [0, 0, 1, 1], [], []>} : vector<8x32xbf16>, vector<32x32xbf16>, vector<8x32xf32> -> vector<8x32xf32>
    %c0_4 = arith.constant 0 : index
    %c0_5 = arith.constant 0 : index
    %11 = vector.load %arg4[%c0_4, %c0_5] : memref<1x32xf32, #tpu.memory_space<vmem>>, vector<1x32xf32>
    %12 = vector.broadcast %11 : vector<1x32xf32> to vector<8x32xf32>
    %13 = arith.addf %10, %12 : vector<8x32xf32>
    %cst_6 = arith.constant 0.353553385 : f32
    %14 = vector.broadcast %cst_6 : f32 to vector<8x32xf32>
    %15 = arith.mulf %13, %14 : vector<8x32xf32>
    %16 = vector.shape_cast %15 : vector<8x32xf32> to vector<8x4x8xf32>
    %17 = tpu.transpose %16, [1, 0, 2] : vector<8x4x8xf32> -> vector<4x8x8xf32>
    %18 = arith.truncf %17 : vector<4x8x8xf32> to vector<4x8x8xbf16>
    %c0_7 = arith.constant 0 : index
    %c0_8 = arith.constant 0 : index
    %c0_9 = arith.constant 0 : index
    %19 = vector.load %arg24[%c0_7, %c0_8, %c0_9] : memref<4x8x8xbf16, #tpu.memory_space<vmem>>, vector<4x8x8xbf16>
    "tpu.trace_start"() <{level = 10 : i32, message = "hqk,hsk->hqs"}> : () -> ()
    %cst_10 = arith.constant dense<0.000000e+00> : vector<4x8x8xf32>
    %20 = tpu.matmul %18, %19, %cst_10 {dimension_numbers = #tpu.dot_dimension_numbers<[2], [2], [1], [1], [0, 0, 0, 1, 1, 1], [0], [0]>} : vector<4x8x8xbf16>, vector<4x8x8xbf16>, vector<4x8x8xf32> -> vector<4x8x8xf32>
    "tpu.trace_stop"() : () -> ()
    %cst_11 = arith.constant dense<0xFF800000> : vector<4x8xf32>
    %21 = vector.multi_reduction <maximumf>, %20, %cst_11 [2] : vector<4x8x8xf32> to vector<4x8xf32>
    %22 = vector.shape_cast %21 : vector<4x8xf32> to vector<4x8x1xf32>
    %23 = vector.broadcast %22 : vector<4x8x1xf32> to vector<4x8x8xf32>
    %24 = arith.subf %20, %23 : vector<4x8x8xf32>
    %25 = math.exp %24 : vector<4x8x8xf32>
    %cst_12 = arith.constant dense<0.000000e+00> : vector<4x8xf32>
    %26 = vector.multi_reduction <add>, %25, %cst_12 [2] : vector<4x8x8xf32> to vector<4x8xf32>
    %27 = vector.shape_cast %26 : vector<4x8xf32> to vector<4x8x1xf32>
    %28 = tpu.reciprocal %27 {approx = true} : vector<4x8x1xf32> -> vector<4x8x1xf32>
    %29 = vector.broadcast %28 : vector<4x8x1xf32> to vector<4x8x8xf32>
    %30 = arith.mulf %25, %29 : vector<4x8x8xf32>
    %c0_13 = arith.constant 0 : index
    %c0_14 = arith.constant 0 : index
    %c0_15 = arith.constant 0 : index
    %c0_16 = arith.constant 0 : index
    %31 = vector.load %arg22[%c0_13, %c0_14, %c0_15, %c0_16] : memref<1x4x8x8xf32, #tpu.memory_space<vmem>>, vector<1x4x8x8xf32>
    %32 = vector.shape_cast %31 : vector<1x4x8x8xf32> to vector<4x8x8xf32>
    %33 = vector.shape_cast %30 : vector<4x8x8xf32> to vector<1x4x8x8xf32>
    tpu.vector_store %arg22[%c0_13, %c0_14, %c0_15, %c0_16], %33 {strides = array<i32>} : memref<1x4x8x8xf32, #tpu.memory_space<vmem>>, vector<1x4x8x8xf32>,
    %34 = tpu.iota {dimensions = array<i32: 0>} : vector<8x8xi32>
    %c8_i32_17 = arith.constant 8 : i32
    %35 = arith.muli %arg1, %c8_i32_17 : i32
    %36 = vector.broadcast %35 : i32 to vector<8x8xi32>
    %37 = arith.addi %34, %36 : vector<8x8xi32>
    %38 = tpu.iota {dimensions = array<i32: 1>} : vector<8x8xi32>
    %39 = arith.subi %37, %38 : vector<8x8xi32>
    %40 = arith.sitofp %39 : vector<8x8xi32> to vector<8x8xf32>
    %41 = arith.mulf %40, %40 : vector<8x8xf32>
    %cst_18 = arith.constant -5.000000e-01 : f32
    %42 = vector.broadcast %cst_18 : f32 to vector<8x8xf32>
    %43 = arith.mulf %41, %42 : vector<8x8xf32>
    %c0_19 = arith.constant 0 : index
    %c0_20 = arith.constant 0 : index
    %44 = vector.load %arg9[%c0_19, %c0_20] : memref<4x32xf32, #tpu.memory_space<vmem>>, vector<4x32xf32>
    "tpu.trace_start"() <{level = 10 : i32, message = "hd,qd->hq"}> : () -> ()
    %cst_21 = arith.constant dense<0.000000e+00> : vector<4x8xf32>
    %45 = tpu.matmul %44, %7, %cst_21 {dimension_numbers = #tpu.dot_dimension_numbers<[1], [1], [0], [0], [0, 0, 1, 0], [], []>} : vector<4x32xf32>, vector<8x32xf32>, vector<4x8xf32> -> vector<4x8xf32>
    "tpu.trace_stop"() : () -> ()
    %c0_22 = arith.constant 0 : index
    %c0_23 = arith.constant 0 : index
    %46 = vector.load %arg10[%c0_22, %c0_23] : memref<4x1xf32, #tpu.memory_space<vmem>>, vector<4x1xf32>
    %47 = vector.broadcast %46 : vector<4x1xf32> to vector<4x8xf32>
    %48 = arith.addf %45, %47 : vector<4x8xf32>
    %cst_24 = arith.constant 5.000000e+00 : f32
    %49 = vector.broadcast %cst_24 : f32 to vector<4x8xf32>
    %50 = arith.mulf %48, %49 : vector<4x8xf32>
    %51 = arith.negf %50 : vector<4x8xf32>
    %52 = math.exp %51 : vector<4x8xf32>
    %cst_25 = arith.constant 1.000000e+00 : f32
    %53 = vector.broadcast %cst_25 : f32 to vector<4x8xf32>
    %54 = arith.addf %53, %52 : vector<4x8xf32>
    %55 = arith.divf %53, %54 : vector<4x8xf32>
    %cst_26 = arith.constant 9.99999974E-6 : f32
    %56 = vector.broadcast %cst_26 : f32 to vector<4x8xf32>
    %57 = arith.addf %55, %56 : vector<4x8xf32>
    %cst_27 = arith.constant 1.09861231 : f32
    %58 = vector.broadcast %cst_27 : f32 to vector<4x8xf32>
    %59 = arith.mulf %57, %58 : vector<4x8xf32>
    %60 = math.exp %59 : vector<4x8xf32>
    %cst_28 = arith.constant 1.000000e+00 : f32
    %61 = vector.broadcast %cst_28 : f32 to vector<4x8xf32>
    %62 = arith.subf %60, %61 : vector<4x8xf32>
    %cst_29 = arith.constant 1.000000e+00 : f32
    %63 = vector.broadcast %cst_29 : f32 to vector<4x8xf32>
    %64 = arith.divf %63, %62 : vector<4x8xf32>
    %65 = vector.shape_cast %64 : vector<4x8xf32> to vector<4x8x1xf32>
    %cst_30 = arith.constant 0.398942292 : f32
    %66 = vector.broadcast %cst_30 : f32 to vector<4x8x1xf32>
    %67 = arith.mulf %66, %65 : vector<4x8x1xf32>
    %68 = vector.shape_cast %43 : vector<8x8xf32> to vector<1x8x8xf32>
    %69 = arith.mulf %65, %65 : vector<4x8x1xf32>
    %70 = vector.broadcast %68 : vector<1x8x8xf32> to vector<4x8x8xf32>
    %71 = vector.broadcast %69 : vector<4x8x1xf32> to vector<4x8x8xf32>
    %72 = arith.mulf %70, %71 : vector<4x8x8xf32>
    %73 = math.exp %72 : vector<4x8x8xf32>
    %74 = vector.broadcast %67 : vector<4x8x1xf32> to vector<4x8x8xf32>
    %75 = arith.mulf %74, %73 : vector<4x8x8xf32>
    %c0_31 = arith.constant 0 : index
    %c0_32 = arith.constant 0 : index
    %c0_33 = arith.constant 0 : index
    %c0_34 = arith.constant 0 : index
    %76 = vector.load %arg23[%c0_31, %c0_32, %c0_33, %c0_34] : memref<1x4x8x8xf32, #tpu.memory_space<vmem>>, vector<1x4x8x8xf32>
    %77 = vector.shape_cast %76 : vector<1x4x8x8xf32> to vector<4x8x8xf32>
    %78 = vector.shape_cast %75 : vector<4x8x8xf32> to vector<1x4x8x8xf32>
    tpu.vector_store %arg23[%c0_31, %c0_32, %c0_33, %c0_34], %78 {strides = array<i32>} : memref<1x4x8x8xf32, #tpu.memory_space<vmem>>, vector<1x4x8x8xf32>,
    %79 = arith.truncf %30 : vector<4x8x8xf32> to vector<4x8x8xbf16>
    %c0_35 = arith.constant 0 : index
    %c0_36 = arith.constant 0 : index
    %c0_37 = arith.constant 0 : index
    %80 = vector.load %arg25[%c0_35, %c0_36, %c0_37] : memref<4x8x8xbf16, #tpu.memory_space<vmem>>, vector<4x8x8xbf16>
    "tpu.trace_start"() <{level = 10 : i32, message = "hqs,hsv->hqv"}> : () -> ()
    %cst_38 = arith.constant dense<0.000000e+00> : vector<4x8x8xf32>
    %81 = tpu.matmul %79, %80, %cst_38 {dimension_numbers = #tpu.dot_dimension_numbers<[2], [1], [1], [2], [0, 0, 0, 1, 1, 2], [0], [0]>} : vector<4x8x8xbf16>, vector<4x8x8xbf16>, vector<4x8x8xf32> -> vector<4x8x8xf32>
    "tpu.trace_stop"() : () -> ()
    %82 = tpu.transpose %81, [1, 0, 2] : vector<4x8x8xf32> -> vector<8x4x8xf32>
    %83 = vector.shape_cast %82 : vector<8x4x8xf32> to vector<8x32xf32>
    %84 = arith.truncf %83 : vector<8x32xf32> to vector<8x32xbf16>
    %c0_39 = arith.constant 0 : index
    %c0_40 = arith.constant 0 : index
    %85 = vector.load %arg11[%c0_39, %c0_40] : memref<32x32xbf16, #tpu.memory_space<vmem>>, vector<32x32xbf16>
    %cst_41 = arith.constant dense<0.000000e+00> : vector<8x32xf32>
    %86 = tpu.matmul %84, %85, %cst_41 {dimension_numbers = #tpu.dot_dimension_numbers<[1], [0], [0], [1], [0, 0, 1, 1], [], []>} : vector<8x32xbf16>, vector<32x32xbf16>, vector<8x32xf32> -> vector<8x32xf32>
    %c0_42 = arith.constant 0 : index
    %c0_43 = arith.constant 0 : index
    %87 = vector.load %arg12[%c0_42, %c0_43] : memref<1x32xf32, #tpu.memory_space<vmem>>, vector<1x32xf32>
    %88 = vector.broadcast %87 : vector<1x32xf32> to vector<8x32xf32>
    %89 = arith.addf %86, %88 : vector<8x32xf32>
    %90 = arith.addf %7, %89 : vector<8x32xf32>
    %c0_44 = arith.constant 0 : index
    %c0_45 = arith.constant 0 : index
    %91 = vector.load %arg13[%c0_44, %c0_45] : memref<1x32xf32, #tpu.memory_space<vmem>>, vector<1x32xf32>
    %c0_46 = arith.constant 0 : index
    %c0_47 = arith.constant 0 : index
    %92 = vector.load %arg14[%c0_46, %c0_47] : memref<1x32xf32, #tpu.memory_space<vmem>>, vector<1x32xf32>
    %cst_48 = arith.constant dense<0.000000e+00> : vector<8xf32>
    %93 = vector.multi_reduction <add>, %90, %cst_48 [1] : vector<8x32xf32> to vector<8xf32>
    %94 = vector.shape_cast %93 : vector<8xf32> to vector<8x1xf32>
    %cst_49 = arith.constant 3.200000e+01 : f32
    %95 = vector.broadcast %cst_49 : f32 to vector<8x1xf32>
    %96 = arith.divf %94, %95 : vector<8x1xf32>
    %97 = vector.broadcast %96 : vector<8x1xf32> to vector<8x32xf32>
    %98 = arith.subf %90, %97 : vector<8x32xf32>
    %99 = arith.mulf %98, %98 : vector<8x32xf32>
    %cst_50 = arith.constant dense<0.000000e+00> : vector<8xf32>
    %100 = vector.multi_reduction <add>, %99, %cst_50 [1] : vector<8x32xf32> to vector<8xf32>
    %101 = vector.shape_cast %100 : vector<8xf32> to vector<8x1xf32>
    %cst_51 = arith.constant 3.200000e+01 : f32
    %102 = vector.broadcast %cst_51 : f32 to vector<8x1xf32>
    %103 = arith.divf %101, %102 : vector<8x1xf32>
    %104 = vector.broadcast %96 : vector<8x1xf32> to vector<8x32xf32>
    %105 = arith.subf %90, %104 : vector<8x32xf32>
    %cst_52 = arith.constant 9.99999974E-6 : f32
    %106 = vector.broadcast %cst_52 : f32 to vector<8x1xf32>
    %107 = arith.addf %103, %106 : vector<8x1xf32>
    %108 = math.rsqrt %107 : vector<8x1xf32>
    %109 = vector.broadcast %108 : vector<8x1xf32> to vector<8x32xf32>
    %110 = arith.mulf %105, %109 : vector<8x32xf32>
    %111 = vector.broadcast %91 : vector<1x32xf32> to vector<8x32xf32>
    %112 = arith.mulf %110, %111 : vector<8x32xf32>
    %113 = vector.broadcast %92 : vector<1x32xf32> to vector<8x32xf32>
    %114 = arith.addf %112, %113 : vector<8x32xf32>
    %115 = arith.truncf %114 : vector<8x32xf32> to vector<8x32xbf16>
    %c0_53 = arith.constant 0 : index
    %c0_54 = arith.constant 0 : index
    %116 = vector.load %arg15[%c0_53, %c0_54] : memref<32x64xbf16, #tpu.memory_space<vmem>>, vector<32x64xbf16>
    %cst_55 = arith.constant dense<0.000000e+00> : vector<8x64xf32>
    %117 = tpu.matmul %115, %116, %cst_55 {dimension_numbers = #tpu.dot_dimension_numbers<[1], [0], [0], [1], [0, 0, 1, 1], [], []>} : vector<8x32xbf16>, vector<32x64xbf16>, vector<8x64xf32> -> vector<8x64xf32>
    %c0_56 = arith.constant 0 : index
    %c0_57 = arith.constant 0 : index
    %118 = vector.load %arg16[%c0_56, %c0_57] : memref<1x64xf32, #tpu.memory_space<vmem>>, vector<1x64xf32>
    %119 = vector.broadcast %118 : vector<1x64xf32> to vector<8x64xf32>
    %120 = arith.addf %117, %119 : vector<8x64xf32>
    %cst_58 = arith.constant 5.000000e-01 : f32
    %121 = vector.broadcast %cst_58 : f32 to vector<8x64xf32>
    %122 = arith.mulf %121, %120 : vector<8x64xf32>
    %cst_59 = arith.constant 1.41421354 : f32
    %123 = vector.broadcast %cst_59 : f32 to vector<8x64xf32>
    %124 = arith.divf %120, %123 : vector<8x64xf32>
    %125 = math.erf %124 : vector<8x64xf32>
    %cst_60 = arith.constant 1.000000e+00 : f32
    %126 = vector.broadcast %cst_60 : f32 to vector<8x64xf32>
    %127 = arith.addf %126, %125 : vector<8x64xf32>
    %128 = arith.mulf %122, %127 : vector<8x64xf32>
    %129 = arith.truncf %128 : vector<8x64xf32> to vector<8x64xbf16>
    %c0_61 = arith.constant 0 : index
    %c0_62 = arith.constant 0 : index
    %130 = vector.load %arg17[%c0_61, %c0_62] : memref<64x32xbf16, #tpu.memory_space<vmem>>, vector<64x32xbf16>
    %cst_63 = arith.constant dense<0.000000e+00> : vector<8x32xf32>
    %131 = tpu.matmul %129, %130, %cst_63 {dimension_numbers = #tpu.dot_dimension_numbers<[1], [0], [0], [1], [0, 0, 1, 1], [], []>} : vector<8x64xbf16>, vector<64x32xbf16>, vector<8x32xf32> -> vector<8x32xf32>
    %c0_64 = arith.constant 0 : index
    %c0_65 = arith.constant 0 : index
    %132 = vector.load %arg18[%c0_64, %c0_65] : memref<1x32xf32, #tpu.memory_space<vmem>>, vector<1x32xf32>
    %133 = vector.broadcast %132 : vector<1x32xf32> to vector<8x32xf32>
    %134 = arith.addf %131, %133 : vector<8x32xf32>
    %135 = arith.addf %114, %134 : vector<8x32xf32>
    %c0_66 = arith.constant 0 : index
    %c0_67 = arith.constant 0 : index
    %136 = vector.load %arg19[%c0_66, %c0_67] : memref<1x32xf32, #tpu.memory_space<vmem>>, vector<1x32xf32>
    %c0_68 = arith.constant 0 : index
    %c0_69 = arith.constant 0 : index
    %137 = vector.load %arg20[%c0_68, %c0_69] : memref<1x32xf32, #tpu.memory_space<vmem>>, vector<1x32xf32>
    %cst_70 = arith.constant dense<0.000000e+00> : vector<8xf32>
    %138 = vector.multi_reduction <add>, %135, %cst_70 [1] : vector<8x32xf32> to vector<8xf32>
    %139 = vector.shape_cast %138 : vector<8xf32> to vector<8x1xf32>
    %cst_71 = arith.constant 3.200000e+01 : f32
    %140 = vector.broadcast %cst_71 : f32 to vector<8x1xf32>
    %141 = arith.divf %139, %140 : vector<8x1xf32>
    %142 = vector.broadcast %141 : vector<8x1xf32> to vector<8x32xf32>
    %143 = arith.subf %135, %142 : vector<8x32xf32>
    %144 = arith.mulf %143, %143 : vector<8x32xf32>
    %cst_72 = arith.constant dense<0.000000e+00> : vector<8xf32>
    %145 = vector.multi_reduction <add>, %144, %cst_72 [1] : vector<8x32xf32> to vector<8xf32>
    %146 = vector.shape_cast %145 : vector<8xf32> to vector<8x1xf32>
    %cst_73 = arith.constant 3.200000e+01 : f32
    %147 = vector.broadcast %cst_73 : f32 to vector<8x1xf32>
    %148 = arith.divf %146, %147 : vector<8x1xf32>
    %149 = vector.broadcast %141 : vector<8x1xf32> to vector<8x32xf32>
    %150 = arith.subf %135, %149 : vector<8x32xf32>
    %cst_74 = arith.constant 9.99999974E-6 : f32
    %151 = vector.broadcast %cst_74 : f32 to vector<8x1xf32>
    %152 = arith.addf %148, %151 : vector<8x1xf32>
    %153 = math.rsqrt %152 : vector<8x1xf32>
    %154 = vector.broadcast %153 : vector<8x1xf32> to vector<8x32xf32>
    %155 = arith.mulf %150, %154 : vector<8x32xf32>
    %156 = vector.broadcast %136 : vector<1x32xf32> to vector<8x32xf32>
    %157 = arith.mulf %155, %156 : vector<8x32xf32>
    %158 = vector.broadcast %137 : vector<1x32xf32> to vector<8x32xf32>
    %159 = arith.addf %157, %158 : vector<8x32xf32>
    %c0_75 = arith.constant 0 : index
    %c0_76 = arith.constant 0 : index
    %c0_77 = arith.constant 0 : index
    %160 = vector.load %arg21[%c0_75, %c0_76, %c0_77] : memref<1x8x32xf32, #tpu.memory_space<vmem>>, vector<1x8x32xf32>
    %161 = vector.shape_cast %160 : vector<1x8x32xf32> to vector<8x32xf32>
    %162 = vector.shape_cast %159 : vector<8x32xf32> to vector<1x8x32xf32>
    tpu.vector_store %arg21[%c0_75, %c0_76, %c0_77], %162 {strides = array<i32>} : memref<1x8x32xf32, #tpu.memory_space<vmem>>, vector<1x8x32xf32>,
    return
  }
  func.func @transform_0(%arg0: i32, %arg1: i32) -> (i32, i32, i32) {
    %c0_i32 = arith.constant 0 : i32
    %c0_i32_0 = arith.constant 0 : i32
    %c0_i32_1 = arith.constant 0 : i32
    return %arg0, %c0_i32, %c0_i32_0 : i32, i32, i32
  }
  func.func @transform_1(%arg0: i32, %arg1: i32) -> (i32, i32) {
    %c0_i32 = arith.constant 0 : i32
    %c0_i32_0 = arith.constant 0 : i32
    %c0_i32_1 = arith.constant 0 : i32
    return %c0_i32, %c0_i32_0 : i32, i32
  }
  func.func @transform_2(%arg0: i32, %arg1: i32) -> (i32, i32) {
    %c0_i32 = arith.constant 0 : i32
    %c0_i32_0 = arith.constant 0 : i32
    %c0_i32_1 = arith.constant 0 : i32
    return %c0_i32, %c0_i32_0 : i32, i32
  }
  func.func @transform_3(%arg0: i32, %arg1: i32) -> (i32, i32) {
    %c0_i32 = arith.constant 0 : i32
    %c0_i32_0 = arith.constant 0 : i32
    %c0_i32_1 = arith.constant 0 : i32
    return %c0_i32, %c0_i32_0 : i32, i32
  }
  func.func @transform_4(%arg0: i32, %arg1: i32) -> (i32, i32) {
    %c0_i32 = arith.constant 0 : i32
    %c0_i32_0 = arith.constant 0 : i32
    %c0_i32_1 = arith.constant 0 : i32
    return %c0_i32, %c0_i32_0 : i32, i32
  }
  func.func @transform_5(%arg0: i32, %arg1: i32) -> (i32, i32) {
    %c0_i32 = arith.constant 0 : i32
    %c0_i32_0 = arith.constant 0 : i32
    %c0_i32_1 = arith.constant 0 : i32
    return %c0_i32, %c0_i32_0 : i32, i32
  }
  func.func @transform_6(%arg0: i32, %arg1: i32) -> (i32, i32) {
    %c0_i32 = arith.constant 0 : i32
    %c0_i32_0 = arith.constant 0 : i32
    %c0_i32_1 = arith.constant 0 : i32
    return %c0_i32, %c0_i32_0 : i32, i32
  }
  func.func @transform_7(%arg0: i32, %arg1: i32) -> (i32, i32) {
    %c0_i32 = arith.constant 0 : i32
    %c0_i32_0 = arith.constant 0 : i32
    %c0_i32_1 = arith.constant 0 : i32
    return %c0_i32, %c0_i32_0 : i32, i32
  }
  func.func @transform_8(%arg0: i32, %arg1: i32) -> (i32, i32) {
    %c0_i32 = arith.constant 0 : i32
    %c0_i32_0 = arith.constant 0 : i32
    %c0_i32_1 = arith.constant 0 : i32
    return %c0_i32, %c0_i32_0 : i32, i32
  }
  func.func @transform_9(%arg0: i32, %arg1: i32) -> (i32, i32) {
    %c0_i32 = arith.constant 0 : i32
    %c0_i32_0 = arith.constant 0 : i32
    %c0_i32_1 = arith.constant 0 : i32
    return %c0_i32, %c0_i32_0 : i32, i32
  }
  func.func @transform_10(%arg0: i32, %arg1: i32) -> (i32, i32) {
    %c0_i32 = arith.constant 0 : i32
    %c0_i32_0 = arith.constant 0 : i32
    %c0_i32_1 = arith.constant 0 : i32
    return %c0_i32, %c0_i32_0 : i32, i32
  }
  func.func @transform_11(%arg0: i32, %arg1: i32) -> (i32, i32) {
    %c0_i32 = arith.constant 0 : i32
    %c0_i32_0 = arith.constant 0 : i32
    %c0_i32_1 = arith.constant 0 : i32
    return %c0_i32, %c0_i32_0 : i32, i32
  }
  func.func @transform_12(%arg0: i32, %arg1: i32) -> (i32, i32) {
    %c0_i32 = arith.constant 0 : i32
    %c0_i32_0 = arith.constant 0 : i32
    %c0_i32_1 = arith.constant 0 : i32
    return %c0_i32, %c0_i32_0 : i32, i32
  }
  func.func @transform_13(%arg0: i32, %arg1: i32) -> (i32, i32) {
    %c0_i32 = arith.constant 0 : i32
    %c0_i32_0 = arith.constant 0 : i32
    %c0_i32_1 = arith.constant 0 : i32
    return %c0_i32, %c0_i32_0 : i32, i32
  }
  func.func @transform_14(%arg0: i32, %arg1: i32) -> (i32, i32) {
    %c0_i32 = arith.constant 0 : i32
    %c0_i32_0 = arith.constant 0 : i32
    %c0_i32_1 = arith.constant 0 : i32
    return %c0_i32, %c0_i32_0 : i32, i32
  }
  func.func @transform_15(%arg0: i32, %arg1: i32) -> (i32, i32) {
    %c0_i32 = arith.constant 0 : i32
    %c0_i32_0 = arith.constant 0 : i32
    %c0_i32_1 = arith.constant 0 : i32
    return %c0_i32, %c0_i32_0 : i32, i32
  }
  func.func @transform_16(%arg0: i32, %arg1: i32) -> (i32, i32) {
    %c0_i32 = arith.constant 0 : i32
    %c0_i32_0 = arith.constant 0 : i32
    %c0_i32_1 = arith.constant 0 : i32
    return %c0_i32, %c0_i32_0 : i32, i32
  }
  func.func @transform_17(%arg0: i32, %arg1: i32) -> (i32, i32) {
    %c0_i32 = arith.constant 0 : i32
    %c0_i32_0 = arith.constant 0 : i32
    %c0_i32_1 = arith.constant 0 : i32
    return %c0_i32, %c0_i32_0 : i32, i32
  }
  func.func @transform_18(%arg0: i32, %arg1: i32) -> (i32, i32) {
    %c0_i32 = arith.constant 0 : i32
    %c0_i32_0 = arith.constant 0 : i32
    %c0_i32_1 = arith.constant 0 : i32
    return %c0_i32, %c0_i32_0 : i32, i32
  }
  func.func @transform_19(%arg0: i32, %arg1: i32) -> (i32, i32, i32) {
    %c0_i32 = arith.constant 0 : i32
    %c0_i32_0 = arith.constant 0 : i32
    return %arg0, %arg1, %c0_i32 : i32, i32, i32
  }
  func.func @transform_20(%arg0: i32, %arg1: i32) -> (i32, i32, i32, i32) {
    %c0_i32 = arith.constant 0 : i32
    %c0_i32_0 = arith.constant 0 : i32
    %c0_i32_1 = arith.constant 0 : i32
    return %arg0, %c0_i32, %arg1, %c0_i32_0 : i32, i32, i32, i32
  }
  func.func @transform_21(%arg0: i32, %arg1: i32) -> (i32, i32, i32, i32) {
    %c0_i32 = arith.constant 0 : i32
    %c0_i32_0 = arith.constant 0 : i32
    %c0_i32_1 = arith.constant 0 : i32
    return %arg0, %c0_i32, %arg1, %c0_i32_0 : i32, i32, i32, i32
  }
}

</mosaic_0001>

<bundles_post_ra>
// kernel: tpu_custom_call.1
= control target key start
LH: loop header
LB: loop body
LE: loop exit
PB: predicated region body
PF: predicated region fallthrough
CT: control target
= control target key end

     0   :  { %s4453_s0 = inlined_call_operand.vmem [shape: f32[2,8,32], index: 0, kind: input, shape index: {}]   ;;  %s4454_s1 = inlined_call_operand.vmem [shape: bf16[32,32], index: 1, kind: input, shape index: {}]   ;;  %s4455_s2 = inlined_call_operand.hbm [shape: f32[1,32], index: 2, kind: input, shape index: {}]   ;;  %s4456_s3 = inlined_call_operand.vmem [shape: bf16[32,32], index: 3, kind: input, shape index: {}]   ;;  %s4457_s4 = inlined_call_operand.hbm [shape: f32[1,32], index: 4, kind: input, shape index: {}]   ;;  %s4458_s5 = inlined_call_operand.hbm [shape: bf16[32,32], index: 5, kind: input, shape index: {}]   ;;  %s4459_s6 = inlined_call_operand.hbm [shape: f32[1,32], index: 6, kind: input, shape index: {}]   ;;  %s4460_s7 = inlined_call_operand.hbm [shape: f32[4,32], index: 7, kind: input, shape index: {}]   ;;  %s4461_s8 = inlined_call_operand.vmem [shape: f32[4,1], index: 8, kind: input, shape index: {}]   ;;  %s4462_s9 = inlined_call_operand.vmem [shape: bf16[32,32], index: 9, kind: input, shape index: {}]   ;;  %s4463_s10 = inlined_call_operand.hbm [shape: f32[1,32], index: 10, kind: input, shape index: {}]   ;;  %s4464_s11 = inlined_call_operand.hbm [shape: f32[1,32], index: 11, kind: input, shape index: {}]   ;;  %s4465_s12 = inlined_call_operand.hbm [shape: f32[1,32], index: 12, kind: input, shape index: {}]   ;;  %s4466_s13 = inlined_call_operand.hbm [shape: bf16[32,64], index: 13, kind: input, shape index: {}]   ;;  %s4467_s14 = inlined_call_operand.hbm [shape: f32[1,64], index: 14, kind: input, shape index: {}]   ;;  %s4468_s15 = inlined_call_operand.vmem [shape: bf16[64,32], index: 15, kind: input, shape index: {}]   ;;  %s4469_s16 = inlined_call_operand.vmem [shape: f32[1,32], index: 16, kind: input, shape index: {}]   ;;  %s4470_s17 = inlined_call_operand.vmem [shape: f32[1,32], index: 17, kind: input, shape index: {}]   ;;  %s4471_s18 = inlined_call_operand.vmem [shape: f32[1,32], index: 18, kind: input, shape index: {}]   ;;  %s4472_s19 = inlined_call_operand.hbm [shape: f32[2,8,32], index: 19, kind: output, shape index: {0}]   ;;  %s4473_s20 = inlined_call_operand.hbm [shape: f32[2,4,8,8], index: 20, kind: output, shape index: {1}]   ;;  %s4474_s21 = inlined_call_operand.hbm [shape: f32[2,4,8,8], index: 21, kind: output, shape index: {2}]  }
   0x1   :  { %4495 = sst [smem:[#allocation40_spill]] %s4453_s0 }
   0x2   :  { %4496 = sst [smem:[#allocation41_spill]] %s4454_s1 }
   0x3   :  { %4497 = sst [smem:[#allocation42_spill]] %s4455_s2 }
   0x4   :  { %4498 = sst [smem:[#allocation43_spill]] %s4456_s3 }
   0x5   :  { %4499 = sst [smem:[#allocation44_spill]] %s4457_s4 }
   0x6   :  { %4500 = sst [smem:[#allocation45_spill]] %s4458_s5 }
   0x7   :  { %4501 = sst [smem:[#allocation46_spill]] %s4459_s6 }
   0x8   :  { %4502 = sst [smem:[#allocation47_spill]] %s4460_s7 }
   0x9   :  { %4503 = sst [smem:[#allocation48_spill]] %s4461_s8 }
   0xa   :  { %4504 = sst [smem:[#allocation49_spill]] %s4462_s9 }
   0xb   :  { %4505 = sst [smem:[#allocation50_spill]] %s4463_s10 }
   0xc   :  { %4506 = sst [smem:[#allocation51_spill]] %s4464_s11 }
   0xd   :  { %4507 = sst [smem:[#allocation52_spill]] %s4472_s19 }
   0xe   :  { %4508 = sst [smem:[#allocation53_spill]] %s4474_s21 }
   0xf   :  { %27 = vsyncpa [#allocation5], 0 }
  0x10   :  { %28 = vsyncpa [#allocation8], 0 }
  0x11   :  { %29 = vsyncpa [#allocation11], 0 }
  0x12   :  { %30 = vsyncpa [#allocation14], 0 }
  0x13   :  { %31 = vsyncpa [#allocation17], 0 }
  0x14   :  { %32 = vsyncpa [#allocation20], 0 }
  0x15   :  { %33 = vsyncpa [#allocation6], 0 }
  0x16   :  { %35 = vsyncpa [#allocation6 + $0x1], 0 }
  0x17   :  { %36 = vsyncpa [#allocation23], 0 }
  0x18   :  { %38 = vsyncpa [#allocation23 + $0x1], 0  ;;  %s3832_s2 = smov 0   ;;  %s3834_s25 = smov 0  }
  0x19   :  { %s3836_s26 = smov 0   ;;  %s3838_s27 = smov 0  }
  0x1a   :  { %s3840_s3 = smov 0   ;;  %s3842_s28 = smov 0  }
  0x1b LB: > { %4509 = sst [smem:[#allocation33_spill]] %s3673_s2  ;;  %s3863_s29 = sadd.s32 4294967295, %s3693_s28   ;;  %s3693_s28 = sphi %s3842_s28, %s44_s28   ;;  %s3689_s3 = sphi %s3840_s3, %s4561_s3   ;;  %s3685_s27 = sphi %s3838_s27, %s4560_s27   ;;  %s3681_s26 = sphi %s3836_s26, %s4559_s26   ;;  %s3677_s25 = sphi %s3834_s25, %s4563_s25   ;;  %s3673_s2 = sphi %s3832_s2, %s4562_s2  }
  0x1c   : > { %4510 = sst [smem:[#allocation34_spill]] %s3681_s26  ;;  %s4478_s0 = sadd.s32 4294967294, %s3693_s28  }
  0x1d   : > { %4511 = sst [smem:[#allocation35_spill]] %s3689_s3  ;;  %s56_s4 = sadd.s32 1, %s3689_s3 }
  0x1e   : > { %4512 = sst [smem:[#allocation36_spill]] %s3693_s28  ;;  %s469_s30 = sadd.s32 1, %s3681_s26 }
  0x1f   : > { %p58_p0 = scmp.ge.s32.totalorder %s56_s4, 2  ;;  %p479_p1 = scmp.ne.s32.totalorder %s3681_s26, %s3677_s25 }
  0x20   : > { %p480_p2 = scmp.eq.s32.totalorder %s3863_s29, 1  ;;  %p485_p3 = scmp.ne.s32.totalorder %s3677_s25, %s3673_s2 }
  0x21   : > { %s4565_s4 = smov (%p58_p0, %s56_s4), 0  ;;  %p486_p5 = scmp.eq.s32.totalorder %s4478_s0, 1 }
  0x22   : > { %4513 = sst [smem:[#allocation37_spill]] %s4565_s4  ;;  %p3875_p4 = por %p480_p2, %p479_p1 }
  0x23   : > { %s464_s22 = ssub.s32 %s3689_s3, %s4565_s4  ;;  %p2812_p6 = scmp.ge.s32.totalorder %s3693_s28, 1 }
  0x24   : > { %s4514_s5 = scalar_select %p3875_p4, 1, 0 }
  0x25   : > { %p467_p7 = scmp.eq.s32.totalorder %s464_s22, 0  ;;  %p3884_p8 = por %p486_p5, %p485_p3 }
  0x26   : > { %p549_p9 = scmp.lt.s32.totalorder %s3693_s28, 3  ;;  %p4486_p11 = scmp.eq.s32.totalorder %s3863_s29, 0 }
  0x27   : > { %s4515_s23 = scalar_select %p3884_p8, 1, 0 }
  0x28   : > { %s3890_s1 = scalar_select %p467_p7, %s3681_s26, %s469_s30  }
  0x29   : > { %4516 = sst [smem:[#allocation38_spill]] %s4515_s23  ;;  %p3892_p10 = pnand %p2812_p6, %p549_p9 }
  0x2a   : > { %4517 = sst [smem:[#allocation39_spill]] %s3890_s1  ;;  %s3695_s2 = smov [#allocation7]  }
  0x2b   : > { %s4518_s24 = scalar_select %p3892_p10, 1, 0 }
  0x2c   : > { %p3090_p12 = pneg %p3892_p10  ;;  %s579_s0 = sshll.u32 %s3695_s2, 4  ;;  %s580_s0 = int_to_ptr.vmem [resolvable:$true] %s579_s0 }
  0x2d   : > { %s3696_s4 = smov [#allocation10]   ;;  %s3697_s30 = smov [#allocation13]  }
  0x2e   : > { %s603_s22 = sshll.u32 %s3696_s4, 4  ;;  %p3901_p13 = pnand %p4486_p11, %p3090_p12  ;;  %s604_s22 = int_to_ptr.vmem [resolvable:$true] %s603_s22 }
  0x2f   : > { %s631_s1 = sshll.u32 %s3697_s30, 4  ;;  %s3288_s23 = scalar_lea.vmem %s580_s0, 16  ;;  %s632_s1 = int_to_ptr.vmem [resolvable:$true] %s631_s1 }
  0x30   : > { %p3907_p0 = pneg %p3901_p13  ;;  %p3289_p1 = scmp.ne.s32.totalorder %s580_s0, %s3288_s23 }
  0x31   : > { %s3295_s2 = scalar_lea.vmem %s580_s0, 32  ;;  %p3296_p5 = scmp.lt.s32.totalorder %s580_s0, %s580_s0 }
  0x32   : > { %p3291_p2 = pnand %p3289_p1, %p3907_p0  ;;  %p3297_p6 = scmp.lt.s32.totalorder %s3295_s2, %s3288_s23 }
  0x34   : > { %p3292_p3 = pneg %p3291_p2  ;;  %p3298_p7 = por %p3297_p6, %p3296_p5 }
  0x36   : > { %p3299_p9 = pnand %p3298_p7, %p3292_p3 }
  0x38   : > { %3302 = shalt.err (!%p3299_p9)
}
  0x39   : > { %s4521_s28 = sld [smem:[#allocation44_spill]]  ;;  %s3314_s21 = scalar_lea.vmem %s604_s22, 16 }
  0x3a   : > { %p3315_p12 = scmp.ne.s32.totalorder %s604_s22, %s3314_s21  ;;  %s3321_s19 = scalar_lea.vmem %s604_s22, 32 }
  0x3b   : > { %p3322_p1 = scmp.lt.s32.totalorder %s604_s22, %s604_s22  ;;  %p3323_p2 = scmp.lt.s32.totalorder %s3321_s19, %s3314_s21 }
  0x3c   : > { %p3317_p11 = pnand %p3315_p12, %p3907_p0 }
  0x3d   : > { %p3324_p4 = por %p3323_p2, %p3322_p1 }
  0x3e   : > { %p3318_p8 = pneg %p3317_p11 }
  0x3f   : > { %3096 = dma.hbm_to_vmem [thread:$0]  (!%p3901_p13), %s4521_s28, 16, %s580_s0, [#allocation8]  }
  0x40   : > { %p3325_p10 = pnand %p3324_p4, %p3318_p8 }
  0x42   : > { %3328 = shalt.err (!%p3325_p10)
}
  0x43   : > { %s4522_s6 = sld [smem:[#allocation46_spill]]  ;;  %s3698_s28 = smov [#allocation16]  }
  0x44   : > { %s653_s0 = sshll.u32 %s3698_s28, 4  ;;  %s3340_s4 = scalar_lea.vmem %s632_s1, 16  ;;  %s654_s0 = int_to_ptr.vmem [resolvable:$true] %s653_s0 }
  0x45   : > { %p3341_p3 = scmp.ne.s32.totalorder %s632_s1, %s3340_s4  ;;  %s3347_s30 = scalar_lea.vmem %s632_s1, 32 }
  0x46   : > { %p3348_p6 = scmp.lt.s32.totalorder %s632_s1, %s632_s1  ;;  %p3349_p7 = scmp.lt.s32.totalorder %s3347_s30, %s3340_s4 }
  0x47   : > { %p3343_p11 = pnand %p3341_p3, %p3907_p0 }
  0x48   : > { %p3350_p4 = por %p3349_p7, %p3348_p6 }
  0x49   : > { %3102 = dma.hbm_to_vmem [thread:$0]  (!%p3901_p13), %s4522_s6, 16, %s604_s22, [#allocation11]  }
  0x4a   : > { %p3344_p5 = pneg %p3343_p11 }
  0x4c   : > { %p3351_p8 = pnand %p3350_p4, %p3344_p5 }
  0x4e   : > { %3354 = shalt.err (!%p3351_p8)
}
  0x4f   : > { %s4523_s10 = sld [smem:[#allocation50_spill]]  ;;  %s3366_s22 = scalar_lea.vmem %s654_s0, 16 }
  0x50   : > { %p3367_p10 = scmp.ne.s32.totalorder %s654_s0, %s3366_s22  ;;  %s3373_s23 = scalar_lea.vmem %s654_s0, 32 }
  0x51   : > { %p3374_p1 = scmp.lt.s32.totalorder %s654_s0, %s654_s0  ;;  %p3375_p2 = scmp.lt.s32.totalorder %s3373_s23, %s3366_s22 }
  0x52   : > { %p3369_p9 = pnand %p3367_p10, %p3907_p0 }
  0x53   : > { %p3376_p3 = por %p3375_p2, %p3374_p1 }
  0x54   : > { %p3370_p12 = pneg %p3369_p9 }
  0x55   : > { %3108 = dma.hbm_to_vmem [thread:$0]  (!%p3901_p13), %s4523_s10, 16, %s632_s1, [#allocation14]  }
  0x56   : > { %p3377_p11 = pnand %p3376_p3, %p3370_p12 }
  0x58   : > { %3380 = shalt.err (!%p3377_p11)
}
  0x59   : > { %3114 = dma.hbm_to_vmem [thread:$0]  (!%p3901_p13), %s4465_s12, 16, %s654_s0, [#allocation17]  }
  0x5a   : > { %s3699_s1 = smov [#allocation4]   ;;  %s3700_s30 = smov [#allocation9]  }
  0x5b   : > { %s565_s4 = sshll.u32 %s3699_s1, 4  ;;  %s589_s19 = sshll.u32 %s3700_s30, 4  ;;  %s566_s4 = int_to_ptr.vmem [resolvable:$true] %s565_s4  ;;  %s590_s19 = int_to_ptr.vmem [resolvable:$true] %s589_s19 }
  0x5c   : > { %s3392_s21 = scalar_lea.vmem %s566_s4, 16  ;;  %s3399_s22 = scalar_lea.vmem %s566_s4, 32 }
  0x5d   : > { %p3393_p5 = scmp.ne.s32.totalorder %s566_s4, %s3392_s21  ;;  %p3400_p4 = scmp.lt.s32.totalorder %s566_s4, %s566_s4 }
  0x5e   : > { %p3401_p8 = scmp.lt.s32.totalorder %s3399_s22, %s3392_s21 }
  0x5f   : > { %p3395_p6 = pnand %p3393_p5, %p3907_p0 }
  0x60   : > { %p3402_p10 = por %p3401_p8, %p3400_p4 }
  0x61   : > { %p3396_p7 = pneg %p3395_p6 }
  0x63   : > { %p3403_p9 = pnand %p3402_p10, %p3396_p7 }
  0x65   : > { %3406 = shalt.err (!%p3403_p9)
}
  0x66   : > { %s4524_s2 = sld [smem:[#allocation42_spill]]  ;;  %s3418_s28 = scalar_lea.vmem %s590_s19, 256 }
  0x67   : > { %p3419_p12 = scmp.ne.s32.totalorder %s590_s19, %s3418_s28  ;;  %p3426_p3 = scmp.lt.s32.totalorder %s590_s19, %s590_s19 }
  0x68   : > { %p3427_p11 = scmp.lt.s32.totalorder %s3418_s28, %s3418_s28 }
  0x69   : > { %p3421_p1 = pnand %p3419_p12, %p3907_p0 }
  0x6a   : > { %p3428_p5 = por %p3427_p11, %p3426_p3 }
  0x6b   : > { %p3422_p2 = pneg %p3421_p1 }
  0x6c   : > { %3093 = dma.hbm_to_vmem [thread:$0]  (!%p3901_p13), %s4524_s2, 16, %s566_s4, [#allocation5]  }
  0x6d   : > { %p3429_p6 = pnand %p3428_p5, %p3422_p2 }
  0x6f   : > { %3432 = shalt.err (!%p3429_p6)
}
  0x70   : > { %s3701_s1 = smov 64   ;;  %s3702_s30 = smov 4  }
  0x71   : > { %s4525_s22 = sld [smem:[#allocation45_spill]]  ;;  %s3703_s23 = smov [#allocation12]  }
  0x72   : > { %s614_s0 = sshll.u32 %s3703_s23, 4  ;;  %s3704_s2 = smov [#allocation15]   ;;  %s615_s0 = int_to_ptr.vmem [resolvable:$true] %s614_s0 }
  0x73   : > { %s642_s28 = sshll.u32 %s3704_s2, 4  ;;  %s3444_s6 = scalar_lea.vmem %s615_s0, 64  ;;  %s643_s28 = int_to_ptr.vmem [resolvable:$true] %s642_s28 }
  0x74   : > { %p3445_p7 = scmp.ne.s32.totalorder %s615_s0, %s3444_s6  ;;  %p3452_p10 = scmp.lt.s32.totalorder %s615_s0, %s615_s0 }
  0x75   : > { %p3453_p9 = scmp.lt.s32.totalorder %s3444_s6, %s3444_s6 }
  0x76   : > { %p3447_p4 = pnand %p3445_p7, %p3907_p0 }
  0x77   : > { %3099 = dma.hbm_to_vmem [thread:$0]  (!%p3901_p13), %s4525_s22, 256, %s590_s19, [#allocation8], %s3701_s1, %s3701_s1, %s3702_s30  }
  0x78   : > { %p3448_p8 = pneg %p3447_p4  ;;  %p3454_p12 = por %p3453_p9, %p3452_p10 }
  0x7a   : > { %p3455_p1 = pnand %p3454_p12, %p3448_p8 }
  0x7c   : > { %3458 = shalt.err (!%p3455_p1)
}
  0x7d   : > { %s4526_s7 = sld [smem:[#allocation47_spill]]  ;;  %s3470_s19 = scalar_lea.vmem %s643_s28, 16 }
  0x7e   : > { %p3471_p2 = scmp.ne.s32.totalorder %s643_s28, %s3470_s19  ;;  %s3477_s21 = scalar_lea.vmem %s643_s28, 32 }
  0x7f   : > { %p3478_p5 = scmp.lt.s32.totalorder %s643_s28, %s643_s28  ;;  %p3479_p6 = scmp.lt.s32.totalorder %s3477_s21, %s3470_s19 }
  0x80   : > { %p3473_p3 = pnand %p3471_p2, %p3907_p0 }
  0x81   : > { %p3480_p7 = por %p3479_p6, %p3478_p5 }
  0x82   : > { %p3474_p11 = pneg %p3473_p3 }
  0x83   : > { %3105 = dma.hbm_to_vmem [thread:$0]  (!%p3901_p13), %s4526_s7, 64, %s615_s0, [#allocation11]  }
  0x84   : > { %p3481_p4 = pnand %p3480_p7, %p3474_p11 }
  0x86   : > { %3484 = shalt.err (!%p3481_p4)
}
  0x87   : > { %s4527_s11 = sld [smem:[#allocation51_spill]]  ;;  %s3705_s10 = smov [#allocation18]  }
  0x88   : > { %s663_s23 = sshll.u32 %s3705_s10, 4  ;;  %s3706_s0 = smov [#allocation19]   ;;  %s664_s23 = int_to_ptr.vmem [resolvable:$true] %s663_s23 }
  0x89   : > { %s677_s2 = sshll.u32 %s3706_s0, 4  ;;  %s3496_s4 = scalar_lea.vmem %s664_s23, 256  ;;  %s678_s2 = int_to_ptr.vmem [resolvable:$true] %s677_s2 }
  0x8a   : > { %p3497_p8 = scmp.ne.s32.totalorder %s664_s23, %s3496_s4  ;;  %p3504_p12 = scmp.lt.s32.totalorder %s664_s23, %s664_s23 }
  0x8b   : > { %p3505_p1 = scmp.lt.s32.totalorder %s3496_s4, %s3496_s4 }
  0x8c   : > { %p3499_p10 = pnand %p3497_p8, %p3907_p0 }
  0x8d   : > { %3111 = dma.hbm_to_vmem [thread:$0]  (!%p3901_p13), %s4527_s11, 16, %s643_s28, [#allocation14]  }
  0x8e   : > { %p3500_p9 = pneg %p3499_p10  ;;  %p3506_p2 = por %p3505_p1, %p3504_p12 }
  0x90   : > { %p3507_p3 = pnand %p3506_p2, %p3500_p9 }
  0x92   : > { %3510 = shalt.err (!%p3507_p3)
}
  0x93   : > { %3117 = dma.hbm_to_vmem [thread:$0]  (!%p3901_p13), %s4466_s13, 256, %s664_s23, [#allocation17], %s3701_s1, %s3701_s1, %s3702_s30  }
  0x94   : > { %s3522_s21 = scalar_lea.vmem %s678_s2, 16  ;;  %s3529_s6 = scalar_lea.vmem %s678_s2, 32 }
  0x95   : > { %p3523_p11 = scmp.ne.s32.totalorder %s678_s2, %s3522_s21  ;;  %p3530_p7 = scmp.lt.s32.totalorder %s678_s2, %s678_s2 }
  0x96   : > { %p3531_p4 = scmp.lt.s32.totalorder %s3529_s6, %s3522_s21 }
  0x97   : > { %p3525_p5 = pnand %p3523_p11, %p3907_p0 }
  0x98   : > { %p3532_p8 = por %p3531_p4, %p3530_p7 }
  0x99   : > { %p3526_p6 = pneg %p3525_p5 }
  0x9b   : > { %p3533_p10 = pnand %p3532_p8, %p3526_p6 }
  0x9d   : > { %3536 = shalt.err (!%p3533_p10)
}
  0x9e   : > { %3120 = dma.hbm_to_vmem [thread:$0]  (!%p3901_p13), %s4467_s14, 16, %s678_s2, [#allocation20]  }
  0x9f   : > { %p4528_p9 = scmp.ne.s32.totalorder %s4518_s24, 0 }
  0xa0   : > { %p4529_p12 = scmp.eq.s32.totalorder (!%p4528_p9), %s3863_s29, 0 }
  0xa1   : > { %709 = sbr.rel (%p4528_p9) target bundleno = 2668 (0xa6c), region = 96 }
  0xa6   : > { %3640 = dma.done.wait (%p4529_p12), [#allocation5], 16   ;;  %p4530_p0 = pmov %p4529_p12 }
  0xa8   : > { %3642 = vsyncadd (%p4530_p0), [#allocation5], 4294967280  ;;  %p4531_p1 = pmov %p4530_p0 }
  0xa9   : > { %p4532_p2 = pmov %p4530_p0 }
  0xaa   : > { %3644 = dma.done.wait (%p4531_p1), [#allocation8], 272  }
  0xab   : > { %3646 = vsyncadd (%p4532_p2), [#allocation8], 4294967024  ;;  %p4533_p3 = pmov %p4530_p0 }
  0xac   : > { %p4534_p13 = pmov %p4530_p0 }
  0xad   : > { %3648 = dma.done.wait (%p4533_p3), [#allocation11], 80  }
  0xae   : > { %3650 = vsyncadd (%p4534_p13), [#allocation11], 4294967216  ;;  %p4535_p11 = pmov %p4530_p0 }
  0xaf   : > { %p4536_p5 = pmov %p4530_p0 }
  0xb0   : > { %3652 = dma.done.wait (%p4535_p11), [#allocation14], 32  }
  0xb1   : > { %3654 = vsyncadd (%p4536_p5), [#allocation14], 4294967264  ;;  %p4537_p6 = pmov %p4530_p0 }
  0xb2   : > { %p4538_p7 = pmov %p4530_p0 }
  0xb3   : > { %3656 = dma.done.wait (%p4537_p6), [#allocation17], 272  }
  0xb4   : > { %3658 = vsyncadd (%p4538_p7), [#allocation17], 4294967024  ;;  %p4539_p4 = pmov %p4530_p0 }
  0xb5   : > { %p4540_p8 = pmov %p4530_p0 }
  0xb6   : > { %3660 = dma.done.wait (%p4539_p4), [#allocation20], 16  }
  0xb7   : > { %3662 = vsyncadd (%p4540_p8), [#allocation20], 4294967280  ;;  %p814_p10 = scmp.lt.s32.totalorder %s3685_s27, 1  ;;  %v3707_v0 = vmov 0.0   ;;  %vm3708_vm0 = vmmov 0   ;;  %s4541_s30 = sld [smem:[#allocation40_spill]]  ;;  %v970_v28 = vlaneseq }
  0xb8   : > { %2939 = vmatprep.subr.bf16.mxu0 %v3707_v0  ;;  %2943 = vmatprep.mubr.msk.bf16.mxu0 %vm3708_vm0, %v3707_v0  ;;  %s4542_s4 = sld [smem:[#allocation43_spill]]  ;;  %vm848_vm1 = vcmask 261120   ;;  %v3227_v5 = vld [vmem:[#allocation9 + $0x8] sm:$0xff]   ;;  %v3228_v6 = vld [vmem:[#allocation9] sm:$0xff]   ;;  %v2839_v9 = vld [vmem:[#allocation7] ss:$0 sm:$0xff] }
  0xb9   : > { %s815_s26 = scalar_select %p814_p10, %s3685_s27, 1  ;;  %2963 = vmatprep.subr.bf16.mxu1 %v3707_v0  ;;  %2965 = vmatprep.mubr.msk.bf16.mxu1 %vm3708_vm0, %v3707_v0  ;;  %v2851_v19 = vld [vmem:[#allocation4] ss:$0 sm:$0xff]  ;;  %v3712_v26 = vmov 1983009808   ;;  %v4069_v32 = vshrl.u32 %v970_v28, 7 }
  0xba   : > { %s4543_s22 = sld [smem:[#allocation41_spill]]  ;;  %s3710_s24 = smov 104   ;;  %v968_v27 = vunpack.c.l.s4 %v3712_v26  ;;  %v3713_v29 = vmov 1934713408   ;;  %vm1105_vm2 = vcmask 60416   ;;  %vm1490_vm3 = vcmask 64512  }
  0xbb   : > { %s2838_s3 = sshll.u32 %s815_s26, 3  ;;  %s3711_s1 = smov 112   ;;  %v1000_v30 = vunpack.c.l.s4 %v3713_v29  ;;  %vm1897_vm4 = vcmask 1043456   ;;  %vm2228_vm5 = vcmask 130048   ;;  %vm2230_vm6 = vcmask 195584  }
  0xbc   : > { %v969_v31 = vunpack.c.0.s8 %v968_v27  ;;  %s4544_s9 = sld [smem:[#allocation49_spill]]  ;;  %s3714_s6 = smov 16   ;;  %vm2443_vm7 = vcmask 523264  }
  0xbd   : > { %s817_s23 = scalar_lea.vmem %s4541_s30, %s2838_s3  ;;  %s3709_s3 = smov 120   ;;  %v1001_v35 = vunpack.c.0.s8 %v1000_v30 }
  0xbe   : > { %v3225_v1 = vld [vmem:[%s4542_s4 + $0x8] sm:$0xff]   ;;  %v3226_v2 = vld [vmem:[%s4542_s4] sm:$0xff]   ;;  %v4072_v36 = vsub.s32 %v969_v31, %v4069_v32  ;;  %s4192_s30 = sand.u32 1, %s3677_s25   ;;  %s4490_s10 = smov 8  }
  0xbf   : > { %2940 = vmatpush3.bf16.msra.mxu0 %v3225_v1  ;;  %v4030_v3 = vld [vmem:[%s817_s23] sm:$0xff]  ;;  %v4075_v42 = vsub.s32 %v1001_v35, %v4069_v32  ;;  %s2836_s23 = sshll.u32 %s4192_s30, 5  ;;  %s3716_s26 = smov 24  }
  0xc0   : > { %2941 = vmatprep.subr.bf16.mxu0 %v3707_v0  ;;  %v824_v4 = vpack.c.bf16 %v4030_v3, %v4030_v3  ;;  %v3229_v7 = vld [vmem:[%s4543_s22 + $0x8] sm:$0xff]   ;;  %v3230_v8 = vld [vmem:[%s4543_s22] sm:$0xff]   ;;  %s4199_s0 = scalar_lea.vmem [#allocation22], %s2836_s23  ;;  %s4545_s8 = sld [smem:[#allocation48_spill]] }
  0xc1   : > { %s2523_s28 = sand.u32 1, %s3863_s29   ;;  %s4492_s19 = sshll.u32 %s3685_s27, 9 }
  0xc2   : > { %p4546_p12 = scmp.ne.s32.totalorder %s4514_s5, 0  ;;  %s3718_s29 = smov [#allocation22]  }
  0xc3   : > { %2942 = vmatpush3.bf16.msra.mxu0 %v3226_v2  ;;  %s3541_s2 = sshll.u32 %s3718_s29, 4  ;;  %s3542_s2 = int_to_ptr.vmem [resolvable:$false] %s3541_s2 }
  0xc4   : > { %2947 = vmatprep.subr.bf16.mxu0 %v3707_v0 }
  0xc6   : > { %2944 = vmatmul.mubr.msk.bf16.vlgmr.msra.gmra.mxu0 %vm848_vm1, %v824_v4 }
  0xc7   : > { %2948 = vmatpush3.bf16.msra.mxu0 %v3227_v5  ;;  %2951 = vmatprep.mubr.msk.bf16.mxu0 %vm3708_vm0, %v3707_v0 }
  0xc8   : > { %2949 = vmatprep.subr.bf16.mxu0 %v3707_v0 }
  0xcb   : > { %2950 = vmatpush3.bf16.msra.mxu0 %v3228_v6 }
  0xcc   : > { %2955 = vmatprep.subr.bf16.mxu0 %v3707_v0 }
  0xce   : > { %2952 = vmatmul.mubr.msk.bf16.vlgmr.msra.gmra.mxu0 %vm848_vm1, %v824_v4 }
  0xcf   : > { %2956 = vmatpush3.bf16.msra.mxu0 %v3229_v7  ;;  %2959 = vmatprep.mubr.msk.bf16.mxu0 %vm3708_vm0, %v3707_v0 }
  0xd0   : > { %2957 = vmatprep.subr.bf16.mxu0 %v3707_v0 }
  0xd3   : > { %2958 = vmatpush3.bf16.msra.mxu0 %v3230_v8 }
  0xd4   : > { %2969 = vmatprep.subr.bf16.mxu0 %v3707_v0 }
  0xd6   : > { %2960 = vmatmul.mubr.msk.bf16.vlgmr.msra.gmra.mxu0 %vm848_vm1, %v824_v4 }
  0xd7   : > { %2971 = vmatprep.mubr.msk.bf16.mxu0 %vm3708_vm0, %v3707_v0 }
 0x186   : > { %v886_v10 = vpop.f32.mrf.mxu0 }
 0x187   : > { %v887_v11 = vadd.f32 %v2839_v9, %v886_v10 }
 0x188   : > { %v2945_v12 = vpop.f32.mrf.mxu0 }
 0x189   : > { %956 = vrot.lane.b32.xlu0 %v887_v11, %s3709_s3  ;;  %962 = vrot.lane.b32.xlu1 %v887_v11, %s3710_s24 }
 0x18a   : > { %v889_v13 = vpop.f32.mrf.mxu0 }
 0x18c   : > { %v2946_v14 = vpop.f32.mrf.mxu0 }
 0x18d   : > { %959 = vrot.lane.b32.xlu0 %v887_v11, %s3711_s1 }
 0x18e   : > { %v4058_v15 = vpop.f32.mrf.mxu0 }
 0x190   : > { %v2953_v16 = vpop.f32.mrf.mxu0 }
 0x192   : > { %v952_v17 = vpop.f32.mrf.mxu0 }
 0x194   : > { %v2954_v18 = vpop.f32.mrf.mxu0 }
 0x196   : > { %v1329_v20 = vpop.f32.mrf.mxu0 }
 0x197   : > { %v1330_v21 = vadd.f32 %v2851_v19, %v1329_v20 }
 0x198   : > { %v2961_v22 = vpop.f32.mrf.mxu0 }
 0x199   : > { %v4060_v23 = vmul.f32 0.35355338, %v1330_v21 }
 0x19a   : > { %v1332_v24 = vpop.f32.mrf.mxu0 }
 0x19b   : > { %1340 = vrot.lane.b32.xlu0 %v4060_v23, %s3711_s1  ;;  %1337 = vrot.lane.b32.xlu1 %v4060_v23, %s3709_s3 }
 0x19c   : > { %v2962_v25 = vpop.f32.mrf.mxu0 }
 0x19f   : > { %1343 = vrot.lane.b32.xlu1 %v4060_v23, %s3710_s24 }
 0x1fb   : > { %v957_v33 = vpop.permute.xlu0 %956  ;;  %v963_v34 = vpop.permute.xlu1 %962 }
 0x1fc   : > { %v981_v37 = vcombine.low %v957_v33, %v963_v34  ;;  %v982_v38 = vcombine.high %v957_v33, %v963_v34 }
 0x1fe   : > { %v989_v43 = vrot.slane %v981_v37, %v4072_v36  ;;  %v996_v44 = vrot.slane %v982_v38, %v4072_v36 }
 0x1ff   : > { %v960_v39 = vpop.permute.xlu0 %959 }
 0x200   : > { %v965_v40 = vcombine.low %v887_v11, %v960_v39  ;;  %v966_v41 = vcombine.high %v887_v11, %v960_v39 }
 0x202   : > { %v973_v45 = vrot.slane %v965_v40, %v4072_v36  ;;  %v980_v46 = vrot.slane %v966_v41, %v4072_v36 }
 0x204   : > { %v997_v47 = vcombine.low %v973_v45, %v989_v43  ;;  %v998_v48 = vcombine.high %v973_v45, %v989_v43  ;;  %v1013_v49 = vcombine.low %v980_v46, %v996_v44  ;;  %v1014_v50 = vcombine.high %v980_v46, %v996_v44 }
 0x206   : > { %v1005_v51 = vrot.slane %v997_v47, %v4075_v42  ;;  %v1012_v52 = vrot.slane %v998_v48, %v4075_v42  ;;  %v1021_v53 = vrot.slane %v1013_v49, %v4075_v42  ;;  %v1028_v54 = vrot.slane %v1014_v50, %v4075_v42 }
 0x208   : > { %v1033_v55 = vcombine.low %v1005_v51, %v1012_v52  ;;  %v2847_v56 = vcombine.high %v1005_v51, %v1012_v52  ;;  %v1049_v57 = vcombine.low %v1021_v53, %v1028_v54  ;;  %v2848_v58 = vcombine.high %v1021_v53, %v1028_v54 }
 0x20a   : > { %v1040_v59 = vrot.slane %v1033_v55, %v4072_v36  ;;  %v1048_v60 = vrot.slane %v2847_v56, %v4072_v36  ;;  %v1056_v61 = vrot.slane %v1049_v57, %v4072_v36  ;;  %v1064_v62 = vrot.slane %v2848_v58, %v4072_v36 }
 0x20c   : > { %v1065_v63 = vcombine.low %v1040_v59, %v1048_v60  ;;  %v1066_v1 = vcombine.high %v1040_v59, %v1048_v60  ;;  %v1081_v2 = vcombine.low %v1056_v61, %v1064_v62  ;;  %v1082_v4 = vcombine.high %v1056_v61, %v1064_v62 }
 0x20d   : > { %v1338_v5 = vpop.permute.xlu1 %1337  ;;  %v1341_v10 = vpop.permute.xlu0 %1340 }
 0x20e   : > { %v1073_v6 = vrot.slane %v1065_v63, %v4075_v42  ;;  %v1080_v7 = vrot.slane %v1066_v1, %v4075_v42  ;;  %v1089_v8 = vrot.slane %v1081_v2, %v4075_v42  ;;  %v1096_v9 = vrot.slane %v1082_v4, %v4075_v42 }
 0x20f   : > { %v1346_v16 = vcombine.low %v4060_v23, %v1341_v10  ;;  %v1347_v17 = vcombine.high %v4060_v23, %v1341_v10 }
 0x210   : > { %v1097_v11 = vcombine.low %v1073_v6, %v1089_v8  ;;  %v1098_v12 = vcombine.high %v1073_v6, %v1089_v8  ;;  %v1099_v13 = vcombine.low %v1080_v7, %v1096_v9  ;;  %v1100_v14 = vcombine.high %v1080_v7, %v1096_v9 }
 0x211   : > { %v1344_v18 = vpop.permute.xlu1 %1343  ;;  %v1354_v26 = vrot.slane %v1346_v16, %v4072_v36  ;;  %v1361_v27 = vrot.slane %v1347_v17, %v4072_v36 }
 0x212   : > { %v1101_v19 = vpack.c.bf16 %v1097_v11, %v1097_v11  ;;  %v1102_v20 = vpack.c.bf16 %v1098_v12, %v1098_v12  ;;  %v1103_v21 = vpack.c.bf16 %v1099_v13, %v1099_v13  ;;  %v1104_v22 = vpack.c.bf16 %v1100_v14, %v1100_v14 }
 0x213   : > { %v1362_v24 = vcombine.low %v1338_v5, %v1344_v18  ;;  %v1363_v25 = vcombine.high %v1338_v5, %v1344_v18 }
 0x214   : > { %1106 = vst.msk [vmem:[#allocation2] sm:$0xf] %vm1105_vm2, %v1101_v19  ;;  %1107 = vst.msk [vmem:[#allocation2 + $0x4] sm:$0xf] %vm1105_vm2, %v1102_v20 }
 0x215   : > { %1108 = vst.msk [vmem:[#allocation2 + $0x8] sm:$0xf] %vm1105_vm2, %v1103_v21  ;;  %1109 = vst.msk [vmem:[#allocation2 + $0xc] sm:$0xf] %vm1105_vm2, %v1104_v22  ;;  %v1370_v23 = vrot.slane %v1362_v24, %v4072_v36  ;;  %v1377_v29 = vrot.slane %v1363_v25, %v4072_v36 }
 0x217   : > { %v1378_v30 = vcombine.low %v1354_v26, %v1370_v23  ;;  %v1379_v31 = vcombine.high %v1354_v26, %v1370_v23  ;;  %v1394_v33 = vcombine.low %v1361_v27, %v1377_v29  ;;  %v1395_v34 = vcombine.high %v1361_v27, %v1377_v29 }
 0x219   : > { %v1386_v35 = vrot.slane %v1378_v30, %v4075_v42  ;;  %v1393_v37 = vrot.slane %v1379_v31, %v4075_v42  ;;  %v1402_v38 = vrot.slane %v1394_v33, %v4075_v42  ;;  %v1409_v39 = vrot.slane %v1395_v34, %v4075_v42  ;;  %v2843_v31 = vld [vmem:[#allocation10] ss:$0 sm:$0xff] }
 0x21b   : > { %v1414_v40 = vcombine.low %v1386_v35, %v1393_v37  ;;  %v2855_v41 = vcombine.high %v1386_v35, %v1393_v37  ;;  %v1430_v43 = vcombine.low %v1402_v38, %v1409_v39  ;;  %v2856_v44 = vcombine.high %v1402_v38, %v1409_v39  ;;  %v1486_v45 = vld [vmem:[#allocation2] sm:$0xf]  ;;  %v1487_v46 = vld [vmem:[#allocation2 + $0x4] sm:$0xf]  ;;  %v1733_v37 = vld [vmem:[#allocation12] sm:$0xf] }
 0x21c   : > { %v1495_v47 = vsel %vm1490_vm3, %v1486_v45, 0  ;;  %v1541_v48 = vsel %vm1490_vm3, %v1487_v46, 0  ;;  %v1488_v61 = vld [vmem:[#allocation2 + $0x8] sm:$0xf]  ;;  %v1489_v62 = vld [vmem:[#allocation2 + $0xc] sm:$0xf]  ;;  %v950_v35 = vadd.f32 %v2843_v31, %v4058_v15 }
 0x21d   : > { %v1421_v49 = vrot.slane %v1414_v40, %v4072_v36  ;;  %v1429_v50 = vrot.slane %v2855_v41, %v4072_v36  ;;  %v1437_v51 = vrot.slane %v1430_v43, %v4072_v36  ;;  %v1445_v52 = vrot.slane %v2856_v44, %v4072_v36  ;;  %2964 = vmatpush3.bf16.xpose.msra.mxu1 %v1495_v47 }
 0x21e   : > { %2970 = vmatpush3.bf16.xpose.msra.mxu0 %v1541_v48  ;;  %2975 = vmatprep.subr.bf16.mxu1 %v3707_v0  ;;  %v1587_v5 = vsel %vm1490_vm3, %v1488_v61, 0  ;;  %v1633_v6 = vsel %vm1490_vm3, %v1489_v62, 0 }
 0x21f   : > { %2981 = vmatprep.subr.bf16.mxu0 %v3707_v0  ;;  %v1446_v53 = vcombine.low %v1421_v49, %v1429_v50  ;;  %v1462_v54 = vcombine.low %v1437_v51, %v1445_v52  ;;  %v1447_v55 = vcombine.high %v1421_v49, %v1429_v50  ;;  %v1463_v56 = vcombine.high %v1437_v51, %v1445_v52 }
 0x221   : > { %v1454_v57 = vrot.slane %v1446_v53, %v4075_v42  ;;  %v1470_v58 = vrot.slane %v1462_v54, %v4075_v42  ;;  %v1461_v2 = vrot.slane %v1447_v55, %v4075_v42  ;;  %v1477_v4 = vrot.slane %v1463_v56, %v4075_v42 }
 0x223   : > { %v1478_v59 = vcombine.low %v1454_v57, %v1470_v58  ;;  %v1479_v60 = vcombine.high %v1454_v57, %v1470_v58  ;;  %v1480_v7 = vcombine.low %v1461_v2, %v1477_v4  ;;  %v1481_v8 = vcombine.high %v1461_v2, %v1477_v4 }
 0x225   : > { %v1482_v63 = vpack.c.bf16 %v1478_v59, %v1478_v59  ;;  %v1483_v1 = vpack.c.bf16 %v1479_v60, %v1479_v60  ;;  %v1484_v9 = vpack.c.bf16 %v1480_v7, %v1480_v7  ;;  %v1485_v10 = vpack.c.bf16 %v1481_v8, %v1481_v8 }
 0x227   : > { %2966 = vmatmul.mubr.msk.bf16.vlgmr.msra.gmra.mxu1 %vm1490_vm3, %v1482_v63  ;;  %2972 = vmatmul.mubr.msk.bf16.vlgmr.msra.gmra.mxu0 %vm1490_vm3, %v1483_v1 }
 0x228   : > { %2976 = vmatpush3.bf16.xpose.msra.mxu1 %v1587_v5  ;;  %2982 = vmatpush3.bf16.xpose.msra.mxu0 %v1633_v6 }
 0x229   : > { %2977 = vmatprep.mubr.msk.bf16.mxu1 %vm3708_vm0, %v3707_v0  ;;  %2983 = vmatprep.mubr.msk.bf16.mxu0 %vm3708_vm0, %v3707_v0 }
 0x22a   : > { %2987 = vmatprep.subr.mxu1 %v3707_v0  ;;  %2998 = vmatprep.subr.bf16.mxu0 %v3707_v0 }
 0x22f   : > { %2978 = vmatmul.mubr.msk.bf16.vlgmr.msra.gmra.mxu1 %vm1490_vm3, %v1484_v9  ;;  %2984 = vmatmul.mubr.msk.bf16.vlgmr.msra.gmra.mxu0 %vm1490_vm3, %v1485_v10 }
 0x230   : > { %2988 = vmatpush3.xpose.msk.msra.mxu1 %vm848_vm1, %v4030_v3  ;;  %2989 = vmatprep.mubr.msk.f32.mxu1 %vm3708_vm0, %v3707_v0 }
 0x231   : > { %2992 = vmatprep.subr.bf16.mxu1 %v3707_v0  ;;  %3000 = vmatprep.mubr.msk.bf16.mxu0 %vm3708_vm0, %v3707_v0 }
 0x237   : > { %2990 = vmatmul.mubr.msk.f32.vlgmr.msra.gmra.mxu1 %vm848_vm1, %v1733_v37 }
 0x238   : > { %2994 = vmatprep.mubr.msk.bf16.mxu1 %vm3708_vm0, %v3707_v0 }
 0x2e7   : > { %v1531_v11 = vpop.f32.mrf.mxu1  ;;  %v1577_v12 = vpop.f32.mrf.mxu0 }
 0x2e8   : > { %v1675_v13 = vsel %vm1490_vm3, %v1531_v11, -inf  ;;  %v1678_v14 = vsel %vm1490_vm3, %v1577_v12, -inf }
 0x2e9   : > { %1676 = vmax.xlane.f32.xlu0 %v1675_v13  ;;  %v2967_v16 = vpop.f32.mrf.mxu1  ;;  %1679 = vmax.xlane.f32.xlu1 %v1678_v14  ;;  %v2973_v17 = vpop.f32.mrf.mxu0 }
 0x2eb   : > { %v1534_v18 = vpop.f32.mrf.mxu1  ;;  %v1580_v19 = vpop.f32.mrf.mxu0 }
 0x2ed   : > { %v2968_v20 = vpop.f32.mrf.mxu1  ;;  %v2974_v21 = vpop.f32.mrf.mxu0 }
 0x2ef   : > { %v1623_v22 = vpop.f32.mrf.mxu1  ;;  %v1669_v24 = vpop.f32.mrf.mxu0 }
 0x2f0   : > { %v1681_v25 = vsel %vm1490_vm3, %v1623_v22, -inf  ;;  %v1684_v30 = vsel %vm1490_vm3, %v1669_v24, -inf }
 0x2f1   : > { %1682 = vmax.xlane.f32.xlu0 %v1681_v25  ;;  %v2979_v26 = vpop.f32.mrf.mxu1  ;;  %v2985_v27 = vpop.f32.mrf.mxu0 }
 0x2f3   : > { %v1626_v23 = vpop.f32.mrf.mxu1  ;;  %v1672_v29 = vpop.f32.mrf.mxu0 }
 0x2f5   : > { %v2980_v33 = vpop.f32.mrf.mxu1  ;;  %1685 = vmax.xlane.f32.xlu0 %v1684_v30  ;;  %v2986_v34 = vpop.f32.mrf.mxu0 }
 0x2fa   : > { %1111 = vrot.lane.b32.xlu1 %v950_v35, %s3709_s3  ;;  %s4328_s3 = scalar_lea.sflag [#allocation23], %s2523_s28 }
 0x2fe   : > { %1117 = vrot.lane.b32.xlu1 %v950_v35, %s3710_s24 }
 0x30b   : > { %1114 = vrot.lane.b32.xlu0 %v950_v35, %s3711_s1  ;;  %s4276_s1 = scalar_lea.vmem [#allocation24], %s2836_s23  ;;  %s4323_s23 = scalar_lea.hbm %s4473_s20, %s4492_s19 }
 0x372   : > { %v1677_v38 = vpop.xlane.xlu0 %1676  ;;  %v1680_v39 = vpop.xlane.xlu1 %1679 }
 0x373   : > { %v1687_v40 = vsub.f32 %v1531_v11, %v1677_v38  ;;  %v1688_v41 = vsub.f32 %v1577_v12, %v1680_v39 }
 0x375   : > { %v1691_v43 = vmul.f32 1.442695, %v1687_v40  ;;  %v1693_v44 = vmul.f32 1.442695, %v1688_v41 }
 0x376   : > { %v1112_v15 = vpop.permute.xlu1 %1111 }
 0x377   : > { %3239 = vpow2.f32 %v1691_v43 }
 0x378   : > { %3241 = vpow2.f32 %v1693_v44 }
 0x37a   : > { %v1683_v45 = vpop.xlane.xlu0 %1682  ;;  %v1118_v48 = vpop.permute.xlu1 %1117 }
 0x37b   : > { %v1689_v46 = vsub.f32 %v1623_v22, %v1683_v45  ;;  %v1136_v51 = vcombine.low %v1112_v15, %v1118_v48  ;;  %v1137_v52 = vcombine.high %v1112_v15, %v1118_v48 }
 0x37d   : > { %v1695_v47 = vmul.f32 1.442695, %v1689_v46  ;;  %v1144_v58 = vrot.slane %v1136_v51, %v4072_v36  ;;  %v1151_v60 = vrot.slane %v1137_v52, %v4072_v36 }
 0x37e   : > { %v1686_v49 = vpop.xlane.xlu0 %1685 }
 0x37f   : > { %3243 = vpow2.f32 %v1695_v47  ;;  %v1690_v50 = vsub.f32 %v1669_v24, %v1686_v49  ;;  %v4189_v47 = vpop.f32.mrf.mxu1 }
 0x381   : > { %v1697_v53 = vmul.f32 1.442695, %v1690_v50  ;;  %v2991_v48 = vpop.f32.mrf.mxu1 }
 0x382   : > { %v1115_v54 = vpop.permute.xlu0 %1114 }
 0x383   : > { %3245 = vpow2.f32 %v1697_v53  ;;  %v1120_v55 = vcombine.low %v950_v35, %v1115_v54  ;;  %v1121_v56 = vcombine.high %v950_v35, %v1115_v54 }
 0x384   : > { %v4149_v57 = vpop.eup %3239 }
 0x385   : > { %v4152_v59 = vpop.eup %3241  ;;  %v1128_v61 = vrot.slane %v1120_v55, %v4072_v36  ;;  %v1135_v62 = vrot.slane %v1121_v56, %v4072_v36  ;;  %v1699_v63 = vsel %vm1490_vm3, %v4149_v57, 0.0 }
 0x386   : > { %1700 = vadd.xlane.f32.xlu1 %v1699_v63  ;;  %v1702_v1 = vsel %vm1490_vm3, %v4152_v59, 0.0 }
 0x387   : > { %v1152_v2 = vcombine.low %v1128_v61, %v1144_v58  ;;  %v1153_v4 = vcombine.high %v1128_v61, %v1144_v58  ;;  %v1168_v5 = vcombine.low %v1135_v62, %v1151_v60  ;;  %v1169_v6 = vcombine.high %v1135_v62, %v1151_v60  ;;  %1703 = vadd.xlane.f32.xlu0 %v1702_v1 }
 0x389   : > { %v1160_v7 = vrot.slane %v1152_v2, %v4075_v42  ;;  %v1167_v8 = vrot.slane %v1153_v4, %v4075_v42  ;;  %v1176_v9 = vrot.slane %v1168_v5, %v4075_v42  ;;  %v1183_v10 = vrot.slane %v1169_v6, %v4075_v42 }
 0x38b   : > { %v1188_v11 = vcombine.low %v1160_v7, %v1167_v8  ;;  %v2849_v12 = vcombine.high %v1160_v7, %v1167_v8  ;;  %v1204_v13 = vcombine.low %v1176_v9, %v1183_v10  ;;  %v2850_v14 = vcombine.high %v1176_v9, %v1183_v10 }
 0x38c   : > { %v4165_v16 = vpop.eup %3243 }
 0x38d   : > { %v1195_v17 = vrot.slane %v1188_v11, %v4072_v36  ;;  %v1203_v18 = vrot.slane %v2849_v12, %v4072_v36  ;;  %v1211_v19 = vrot.slane %v1204_v13, %v4072_v36  ;;  %v1219_v20 = vrot.slane %v2850_v14, %v4072_v36 }
 0x38e   : > { %v1705_v21 = vsel %vm1490_vm3, %v4165_v16, 0.0 }
 0x38f   : > { %v1220_v22 = vcombine.low %v1195_v17, %v1203_v18  ;;  %v1221_v24 = vcombine.high %v1195_v17, %v1203_v18  ;;  %v1236_v25 = vcombine.low %v1211_v19, %v1219_v20  ;;  %v1237_v26 = vcombine.high %v1211_v19, %v1219_v20  ;;  %1706 = vadd.xlane.f32.xlu0 %v1705_v21 }
 0x390   : > { %v4173_v27 = vpop.eup %3245 }
 0x391   : > { %v1228_v23 = vrot.slane %v1220_v22, %v4075_v42  ;;  %v1235_v29 = vrot.slane %v1221_v24, %v4075_v42  ;;  %v1244_v30 = vrot.slane %v1236_v25, %v4075_v42  ;;  %v1251_v31 = vrot.slane %v1237_v26, %v4075_v42 }
 0x392   : > { %v1708_v33 = vsel %vm1490_vm3, %v4173_v27, 0.0 }
 0x393   : > { %v1252_v34 = vcombine.low %v1228_v23, %v1244_v30  ;;  %v1253_v35 = vcombine.high %v1228_v23, %v1244_v30  ;;  %v1254_v37 = vcombine.low %v1235_v29, %v1251_v31  ;;  %v1255_v38 = vcombine.high %v1235_v29, %v1251_v31  ;;  %1709 = vadd.xlane.f32.xlu1 %v1708_v33 }
 0x395   : > { %v1256_v39 = vpack.c.bf16 %v1252_v34, %v1252_v34  ;;  %v1257_v40 = vpack.c.bf16 %v1253_v35, %v1253_v35  ;;  %v1258_v41 = vpack.c.bf16 %v1254_v37, %v1254_v37  ;;  %v1259_v43 = vpack.c.bf16 %v1255_v38, %v1255_v38  ;;  %v3231_v38 = vld [vmem:[%s4544_s9 + $0x8] sm:$0xff]  }
 0x397   : > { %1260 = vst.msk [vmem:[#allocation3] sm:$0xf] %vm1105_vm2, %v1256_v39  ;;  %1261 = vst.msk [vmem:[#allocation3 + $0x4] sm:$0xf] %vm1105_vm2, %v1257_v40 }
 0x398   : > { %1262 = vst.msk [vmem:[#allocation3 + $0x8] sm:$0xf] %vm1105_vm2, %v1258_v41  ;;  %1263 = vst.msk [vmem:[#allocation3 + $0xc] sm:$0xf] %vm1105_vm2, %v1259_v43 }
 0x39e   : > { %v1890_v44 = vld [vmem:[#allocation3] sm:$0xf]  ;;  %v1891_v15 = vld [vmem:[#allocation3 + $0x4] sm:$0xf] }
 0x39f   : > { %v1899_v45 = vsel %vm1897_vm4, %v1890_v44, 0  ;;  %v1945_v46 = vsel %vm1897_vm4, %v1891_v15, 0  ;;  %v1892_v58 = vld [vmem:[#allocation3 + $0x8] sm:$0xf]  ;;  %v1893_v61 = vld [vmem:[#allocation3 + $0xc] sm:$0xf] }
 0x3a0   : > { %2993 = vmatpush3.bf16.msra.mxu1 %v1899_v45  ;;  %2999 = vmatpush3.bf16.msra.mxu0 %v1945_v46 }
 0x3a1   : > { %3004 = vmatprep.subr.bf16.mxu1 %v3707_v0  ;;  %3010 = vmatprep.subr.bf16.mxu0 %v3707_v0 }
 0x40f   : > { %v1701_v49 = vpop.xlane.xlu1 %1700 }
 0x410   : > { %3247 = vrcp.f32 %v1701_v49  ;;  %v1704_v50 = vpop.xlane.xlu0 %1703  ;;  %v3232_v49 = vld [vmem:[%s4544_s9] sm:$0xff]  }
 0x411   : > { %3249 = vrcp.f32 %v1704_v50 }
 0x418   : > { %v1707_v51 = vpop.xlane.xlu0 %1706 }
 0x419   : > { %3251 = vrcp.f32 %v1707_v51 }
 0x41c   : > { %v1710_v52 = vpop.xlane.xlu1 %1709 }
 0x41d   : > { %v3248_v53 = vpop.eup %3247  ;;  %3253 = vrcp.f32 %v1710_v52 }
 0x41e   : > { %v3250_v54 = vpop.eup %3249  ;;  %v1715_v55 = vmul.f32 %v3248_v53, %v4149_v57  ;;  %v1991_v57 = vsel %vm1897_vm4, %v1892_v58, 0 }
 0x41f   : > { %v1716_v56 = vmul.f32 %v3250_v54, %v4152_v59  ;;  %v2037_v59 = vsel %vm1897_vm4, %v1893_v61, 0 }
 0x420   : > { %v1886_v60 = vpack.c.bf16 %v1715_v55, %v1715_v55  ;;  %1719 = vst.msk [vmem:[%s4199_s0] sm:$0xff] %vm1490_vm3, %v1715_v55 }
 0x421   : > { %v1887_v62 = vpack.c.bf16 %v1716_v56, %v1716_v56  ;;  %1720 = vst.msk [vmem:[%s4199_s0 + $0x8] sm:$0xff] %vm1490_vm3, %v1716_v56 }
 0x422   : > { %2995 = vmatmul.mubr.msk.bf16.vlgmr.msra.gmra.mxu1 %vm1490_vm3, %v1886_v60 }
 0x423   : > { %3001 = vmatmul.mubr.msk.bf16.vlgmr.msra.gmra.mxu0 %vm1490_vm3, %v1887_v62  ;;  %3005 = vmatpush3.bf16.msra.mxu1 %v1991_v57 }
 0x424   : > { %3011 = vmatpush3.bf16.msra.mxu0 %v2037_v59  ;;  %3006 = vmatprep.mubr.msk.bf16.mxu1 %vm3708_vm0, %v3707_v0 }
 0x425   : > { %3012 = vmatprep.mubr.msk.bf16.mxu0 %vm3708_vm0, %v3707_v0  ;;  %3016 = vmatprep.subr.bf16.mxu1 %v3707_v0 }
 0x426   : > { %v3252_v63 = vpop.eup %3251  ;;  %3024 = vmatprep.subr.bf16.mxu0 %v3707_v0 }
 0x427   : > { %v1717_v1 = vmul.f32 %v3252_v63, %v4165_v16 }
 0x429   : > { %v1888_v2 = vpack.c.bf16 %v1717_v1, %v1717_v1  ;;  %1721 = vst.msk [vmem:[%s4199_s0 + $0x10] sm:$0xff] %vm1490_vm3, %v1717_v1 }
 0x42a   : > { %v3254_v4 = vpop.eup %3253 }
 0x42b   : > { %3007 = vmatmul.mubr.msk.bf16.vlgmr.msra.gmra.mxu1 %vm1490_vm3, %v1888_v2  ;;  %v1718_v5 = vmul.f32 %v3254_v4, %v4173_v27 }
 0x42c   : > { %3020 = vmatprep.mubr.msk.bf16.mxu1 %vm3708_vm0, %v3707_v0  ;;  %3017 = vmatpush3.bf16.msra.mxu1 %v3231_v38 }
 0x42d   : > { %v1889_v6 = vpack.c.bf16 %v1718_v5, %v1718_v5  ;;  %1722 = vst.msk [vmem:[%s4199_s0 + $0x18] sm:$0xff] %vm1490_vm3, %v1718_v5  ;;  %3018 = vmatprep.subr.bf16.mxu1 %v3707_v0 }
 0x42f   : > { %3013 = vmatmul.mubr.msk.bf16.vlgmr.msra.gmra.mxu0 %vm1490_vm3, %v1889_v6 }
 0x430   : > { %3028 = vmatprep.mubr.msk.bf16.mxu0 %vm3708_vm0, %v3707_v0  ;;  %3019 = vmatpush3.bf16.msra.mxu1 %v3232_v49 }
 0x431   : > { %3032 = vmatprep.subr.bf16.mxu1 %v3707_v0 }
 0x4e2   : > { %v1935_v7 = vpop.f32.mrf.mxu1 }
 0x4e3   : > { %v1981_v8 = vpop.f32.mrf.mxu0 }
 0x4e4   : > { %v2996_v9 = vpop.f32.mrf.mxu1 }
 0x4e5   : > { %v3002_v10 = vpop.f32.mrf.mxu0  ;;  %v3717_v9 = vmov 0  }
 0x4e6   : > { %v1938_v11 = vpop.f32.mrf.mxu1  ;;  %3224 = vset.pattern.permute.xlu0 %v3717_v9  ;;  %v2871_v10 = vld [vmem:[#allocation13] ss:$0 sm:$0xff] }
 0x4e7   : > { %v1984_v12 = vpop.f32.mrf.mxu0 }
 0x4e8   : > { %v2997_v13 = vpop.f32.mrf.mxu1 }
 0x4e9   : > { %v3003_v14 = vpop.f32.mrf.mxu0 }
 0x4eb   : > { %v2027_v16 = vpop.f32.mrf.mxu1 }
 0x4ec   : > { %v2079_v18 = vcombine.low %v1935_v7, %v2027_v16  ;;  %v2080_v19 = vcombine.high %v1935_v7, %v2027_v16 }
 0x4ed   : > { %v3008_v17 = vpop.f32.mrf.mxu1 }
 0x4ee   : > { %v2087_v27 = vrot.slane %v2079_v18, %v4072_v36  ;;  %v2094_v23 = vrot.slane %v2080_v19, %v4072_v36  ;;  %v1734_v19 = vld [vmem:[%s4545_s8] sm:$0xf] }
 0x4ef   : > { %v2030_v20 = vpop.f32.mrf.mxu1  ;;  %v2073_v21 = vpop.f32.mrf.mxu0 }
 0x4f0   : > { %v2095_v22 = vcombine.low %v1981_v8, %v2073_v21  ;;  %v2096_v24 = vcombine.high %v1981_v8, %v2073_v21 }
 0x4f1   : > { %v3009_v25 = vpop.f32.mrf.mxu1  ;;  %v3014_v26 = vpop.f32.mrf.mxu0 }
 0x4f2   : > { %v2103_v29 = vrot.slane %v2095_v22, %v4072_v36  ;;  %v2110_v30 = vrot.slane %v2096_v24, %v4072_v36 }
 0x4f3   : > { %v2076_v31 = vpop.f32.mrf.mxu0 }
 0x4f4   : > { %v2111_v33 = vcombine.low %v2087_v27, %v2103_v29  ;;  %v2112_v34 = vcombine.high %v2087_v27, %v2103_v29  ;;  %v2127_v35 = vcombine.low %v2094_v23, %v2110_v30  ;;  %v2128_v37 = vcombine.high %v2094_v23, %v2110_v30  ;;  %v3233_v31 = vld [vmem:[#allocation18 + $0x8] sm:$0xff]  }
 0x4f5   : > { %v3015_v39 = vpop.f32.mrf.mxu0  ;;  %3025 = vmatpush3.bf16.msra.mxu0 %v3233_v31 }
 0x4f6   : > { %v2119_v40 = vrot.slane %v2111_v33, %v4075_v42  ;;  %v2126_v41 = vrot.slane %v2112_v34, %v4075_v42  ;;  %v2135_v43 = vrot.slane %v2127_v35, %v4075_v42  ;;  %v2142_v44 = vrot.slane %v2128_v37, %v4075_v42  ;;  %v3234_v33 = vld [vmem:[#allocation18] sm:$0xff]   ;;  %3026 = vmatprep.subr.bf16.mxu0 %v3707_v0 }
 0x4f8   : > { %v2147_v15 = vcombine.low %v2119_v40, %v2126_v41  ;;  %v2869_v45 = vcombine.high %v2119_v40, %v2126_v41  ;;  %v2163_v46 = vcombine.low %v2135_v43, %v2142_v44  ;;  %v2870_v48 = vcombine.high %v2135_v43, %v2142_v44 }
 0x4f9   : > { %3027 = vmatpush3.bf16.msra.mxu0 %v3234_v33 }
 0x4fa   : > { %v2154_v50 = vrot.slane %v2147_v15, %v4072_v36  ;;  %v2162_v51 = vrot.slane %v2869_v45, %v4072_v36  ;;  %v2170_v52 = vrot.slane %v2163_v46, %v4072_v36  ;;  %v2178_v53 = vrot.slane %v2870_v48, %v4072_v36  ;;  %v2875_v48 = vld [vmem:[#allocation15] ss:$0 sm:$0xff] }
 0x4fc   : > { %v2180_v54 = vcombine.high %v2154_v50, %v2162_v51  ;;  %v2196_v55 = vcombine.high %v2170_v52, %v2178_v53  ;;  %v2179_v56 = vcombine.low %v2154_v50, %v2162_v51  ;;  %v2195_v58 = vcombine.low %v2170_v52, %v2178_v53  ;;  %v2876_v50 = vld [vmem:[#allocation16] ss:$0 sm:$0xff] }
 0x4fe   : > { %v2194_v60 = vrot.slane %v2180_v54, %v4075_v42  ;;  %v2210_v61 = vrot.slane %v2196_v55, %v4075_v42  ;;  %v2187_v62 = vrot.slane %v2179_v56, %v4075_v42  ;;  %v2203_v57 = vrot.slane %v2195_v58, %v4075_v42 }
 0x4ff   : > { %v1728_v54 = vand.u32 127, %v970_v28  ;;  %v3235_v28 = vld [vmem:[%s4468_s15 + $0x18] sm:$0xff]  }
 0x500   : > { %v2213_v59 = vcombine.low %v2194_v60, %v2210_v61  ;;  %v2212_v63 = vcombine.high %v2187_v62, %v2203_v57  ;;  %v2211_v1 = vcombine.low %v2187_v62, %v2203_v57  ;;  %v2214_v36 = vcombine.high %v2194_v60, %v2210_v61 }
 0x501   : > { %v1729_v55 = vsub.s32 %v4069_v32, %v1728_v54 }
 0x502   : > { %2220 = vrot.lane.b32.xlu1 %v2213_v59, %s3714_s6  ;;  %2216 = vrot.lane.b32.xlu0 %v2212_v63, %s4490_s10  ;;  %s3543_s10 = scalar_lea.vmem %s3542_s2, 1024 }
 0x503   : > { %v1730_v56 = vcvt.s32.f32 %v1729_v55 }
 0x505   : > { %v1731_v58 = vmul.f32 %v1730_v56, %v1730_v56 }
 0x506   : > { %2224 = vrot.lane.b32.xlu1 %v2214_v36, %s3716_s26  ;;  %s2557_s26 = sshll.u32 %s4199_s0, 4  ;;  %s4326_s26 = int_to_ptr.vmem [resolvable:$true] %s2557_s26 }
 0x507   : > { %v4271_v60 = vmul.f32 -0.5, %v1731_v58  ;;  %s3537_s24 = scalar_lea.vmem %s4326_s26, 512  ;;  %p3544_p2 = scmp.lt.s32.totalorder %s4326_s26, %s3542_s2 }
 0x508   : > { %p3538_p9 = scmp.ne.s32.totalorder %s4326_s26, %s3537_s24  ;;  %p3545_p3 = scmp.lt.s32.totalorder %s3543_s10, %s3537_s24 }
 0x50a   : > { %p3539_p0 = pnand %p3538_p9, %p4546_p12  ;;  %p3546_p13 = por %p3545_p3, %p3544_p2 }
 0x50c   : > { %p3540_p1 = pneg %p3539_p0 }
 0x50e   : > { %p3547_p11 = pnand %p3546_p13, %p3540_p1 }
 0x574   : > { %v2221_v2 = vpop.permute.xlu1 %2220  ;;  %v2217_v4 = vpop.permute.xlu0 %2216 }
 0x575   : > { %v2227_v5 = vsel %vm1490_vm3, %v2211_v1, %v2217_v4  ;;  %v3237_v4 = vld [vmem:[%s4468_s15 + $0x8] sm:$0xff]  }
 0x576   : > { %v2229_v7 = vsel %vm2228_vm5, %v2227_v5, %v2221_v2  ;;  %v3236_v2 = vld [vmem:[%s4468_s15 + $0x10] sm:$0xff]   ;;  %v3238_v5 = vld [vmem:[%s4468_s15] sm:$0xff]  }
 0x578   : > { %v2225_v6 = vpop.permute.xlu1 %2224 }
 0x579   : > { %v2231_v42 = vsel %vm2230_vm6, %v2229_v7, %v2225_v6  ;;  %v2877_v6 = vld [vmem:[#allocation19] ss:$0 sm:$0xff] }
 0x57a   : > { %v2232_v8 = vpack.c.bf16 %v2231_v42, %v2231_v42 }
 0x57c   : > { %3021 = vmatmul.mubr.msk.bf16.vlgmr.msra.gmra.mxu1 %vm848_vm1, %v2232_v8 }
 0x57d   : > { %3040 = vmatprep.mubr.msk.bf16.mxu1 %vm3708_vm0, %v3707_v0  ;;  %3033 = vmatpush3.bf16.msra.mxu1 %v3235_v28 }
 0x57e   : > { %3034 = vmatprep.subr.bf16.mxu1 %v3707_v0 }
 0x581   : > { %3035 = vmatpush3.bf16.msra.mxu1 %v3236_v2 }
 0x582   : > { %3036 = vmatprep.subr.bf16.mxu1 %v3707_v0 }
 0x585   : > { %3037 = vmatpush3.bf16.msra.mxu1 %v3237_v4 }
 0x586   : > { %3038 = vmatprep.subr.bf16.mxu1 %v3707_v0  ;;  %v2881_v0 = vld [vmem:[%s4469_s16] ss:$0 sm:$0xff] }
 0x589   : > { %3039 = vmatpush3.bf16.msra.mxu1 %v3238_v5 }
 0x63c   : > { %v2293_v11 = vpop.f32.mrf.mxu1 }
 0x63d   : > { %v2294_v12 = vadd.f32 %v2871_v10, %v2293_v11 }
 0x63e   : > { %v3022_v13 = vpop.f32.mrf.mxu1 }
 0x63f   : > { %v2299_v14 = vadd.f32 %v2294_v12, %v4030_v3 }
 0x640   : > { %v2296_v16 = vpop.f32.mrf.mxu1 }
 0x641   : > { %v2302_v17 = vsel %vm848_vm1, %v2299_v14, 0.0 }
 0x642   : > { %2303 = vadd.xlane.f32.xlu0 %v2302_v17  ;;  %v3023_v18 = vpop.f32.mrf.mxu1 }
 0x658   : > { %1737 = vperm.xlu0 %3224, %v1734_v19  }
 0x6cb   : > { %v2304_v20 = vpop.xlane.xlu0 %2303 }
 0x6cc   : > { %v2306_v21 = vmul.f32 0.03125, %v2304_v20 }
 0x6ce   : > { %v2307_v22 = vsub.f32 %v2299_v14, %v2306_v21 }
 0x6d0   : > { %v2308_v24 = vmul.f32 %v2307_v22, %v2307_v22 }
 0x6d2   : > { %v2309_v25 = vsel %vm848_vm1, %v2308_v24, 0.0 }
 0x6d3   : > { %2310 = vadd.xlane.f32.xlu1 %v2309_v25  ;;  %v1738_v26 = vpop.permute.xlu0 %1737 }
 0x6d4   : > { %v1813_v3 = vadd.f32 %v4189_v47, %v1738_v26  ;;  %v1832_v47 = vsub.s32 0, %v4069_v32  ;;  %v1839_v26 = vsub.s32 1, %v4069_v32 }
 0x6d6   : > { %v2863_v27 = vmul.f32 -5.0, %v1813_v3 }
 0x6d8   : > { %v1818_v23 = vmul.f32 1.442695, %v2863_v27  ;;  %v1846_v27 = vsub.s32 2, %v4069_v32 }
 0x6da   : > { %3255 = vpow2.f32 %v1818_v23 }
 0x6e7   : > { %v3256_v29 = vpop.eup %3255 }
 0x6e8   : > { %v1820_v30 = vadd.f32 1.0, %v3256_v29 }
 0x6ea   : > { %3257 = vrcp.f32 %v1820_v30 }
 0x6f7   : > { %v3258_v34 = vpop.eup %3257 }
 0x6f8   : > { %v1823_v35 = vadd.f32 1e-05, %v3258_v34 }
 0x6fa   : > { %v1824_v37 = vmul.f32 1.0986123, %v1823_v35 }
 0x6fc   : > { %v1825_v38 = vmul.f32 1.442695, %v1824_v37 }
 0x6fe   : > { %3259 = vpow2.f32 %v1825_v38 }
 0x70b   : > { %v3260_v39 = vpop.eup %3259 }
 0x70c   : > { %v2864_v40 = vadd.f32 -1.0, %v3260_v39 }
 0x70e   : > { %3261 = vrcp.f32 %v2864_v40 }
 0x71b   : > { %v4265_v41 = vpop.eup %3261 }
 0x71c   : > { %v1833_v43 = vrot.slane %v4265_v41, %v1832_v47  ;;  %v1840_v3 = vrot.slane %v4265_v41, %v1839_v26  ;;  %v1847_v23 = vrot.slane %v4265_v41, %v1846_v27 }
 0x71e   : > { %1835 = vbcast.lane.b32.xlu1 %v1833_v43, 256 }
 0x75c   : > { %v2311_v44 = vpop.xlane.xlu1 %2310 }
 0x75d   : > { %v2312_v15 = vmul.f32 0.03125, %v2311_v44 }
 0x75f   : > { %v2313_v45 = vadd.f32 1e-05, %v2312_v15  ;;  %v1853_v15 = vsub.s32 3, %v4069_v32 }
 0x761   : > { %3263 = vrsqrt.f32 %v2313_v45 }
 0x76e   : > { %v3264_v46 = vpop.eup %3263 }
 0x76f   : > { %v2315_v49 = vmul.f32 %v3264_v46, %v2307_v22  ;;  %v1854_v46 = vrot.slane %v4265_v41, %v1853_v15 }
 0x771   : > { %v2322_v51 = vmul.f32 %v2875_v48, %v2315_v49 }
 0x773   : > { %v2329_v52 = vadd.f32 %v2876_v50, %v2322_v51 }
 0x775   : > { %v2330_v53 = vpack.c.bf16 %v2329_v52, %v2329_v52 }
 0x777   : > { %3029 = vmatmul.mubr.msk.bf16.vlgmr.msra.gmra.mxu0 %vm848_vm1, %v2330_v53 }
 0x790   : > { %v1836_v61 = vpop.permute.xlu1 %1835 }
 0x791   : > { %v1862_v62 = vmul.f32 %v1836_v61, %v1836_v61  ;;  %v1858_v63 = vmul.f32 0.3989423, %v1836_v61 }
 0x793   : > { %v1866_v57 = vmul.f32 %v1862_v62, %v4271_v60 }
 0x795   : > { %v1870_v59 = vmul.f32 1.442695, %v1866_v57 }
 0x797   : > { %3265 = vpow2.f32 %v1870_v59 }
 0x7a4   : > { %v3266_v1 = vpop.eup %3265 }
 0x7a5   : > { %v1878_v36 = vmul.f32 %v3266_v1, %v1858_v63 }
 0x7a7   : > { %1882 = vst.msk [vmem:[%s4276_s1] sm:$0xff] %vm1490_vm3, %v1878_v36 }
 0x837   : > { %v2391_v7 = vpop.f32.mrf.mxu0 }
 0x838   : > { %v2392_v42 = vadd.f32 %v2877_v6, %v2391_v7 }
 0x839   : > { %v3030_v8 = vpop.f32.mrf.mxu0 }
 0x83a   : > { %v2399_v9 = vmul.f32 0.70710677, %v2392_v42  ;;  %v2397_v13 = vmul.f32 0.5, %v2392_v42 }
 0x83b   : > { %v2394_v10 = vpop.f32.mrf.mxu0 }
 0x83c   : > { %3267 = verf.f32 %v2399_v9 }
 0x83d   : > { %v3031_v11 = vpop.f32.mrf.mxu0 }
 0x849   : > { %v3268_v12 = vpop.eup %3267 }
 0x84a   : > { %v2401_v14 = vadd.f32 1.0, %v3268_v12 }
 0x84c   : > { %v2402_v16 = vmul.f32 %v2401_v14, %v2397_v13 }
 0x84e   : > { %v2403_v17 = vpack.c.bf16 %v2402_v16, %v2402_v16 }
 0x850   : > { %3041 = vmatmul.mubr.msk.bf16.vlgmr.msra.gmra.mxu1 %vm2443_vm7, %v2403_v17 }
 0x910   : > { %v2481_v18 = vpop.f32.mrf.mxu1 }
 0x911   : > { %v2482_v19 = vadd.f32 %v2881_v0, %v2481_v18 }
 0x912   : > { %v3042_v20 = vpop.f32.mrf.mxu1 }
 0x913   : > { %v2487_v21 = vadd.f32 %v2482_v19, %v2329_v52 }
 0x914   : > { %v2484_v22 = vpop.f32.mrf.mxu1 }
 0x915   : > { %v2490_v24 = vsel %vm848_vm1, %v2487_v21, 0.0 }
 0x916   : > { %2491 = vadd.xlane.f32.xlu1 %v2490_v24  ;;  %v3043_v25 = vpop.f32.mrf.mxu1 }
 0x927   : > { %1842 = vbcast.lane.b32.xlu1 %v1840_v3, 256 }
 0x92b   : > { %1849 = vbcast.lane.b32.xlu1 %v1847_v23, 256 }
 0x99f   : > { %v2492_v29 = vpop.xlane.xlu1 %2491 }
 0x9a0   : > { %v2493_v30 = vmul.f32 0.03125, %v2492_v29 }
 0x9a2   : > { %v4303_v31 = vsub.f32 %v2487_v21, %v2493_v30 }
 0x9a3   : > { %v1843_v33 = vpop.permute.xlu1 %1842 }
 0x9a4   : > { %v1863_v34 = vmul.f32 %v1843_v33, %v1843_v33  ;;  %v2495_v35 = vmul.f32 %v4303_v31, %v4303_v31  ;;  %v1859_v45 = vmul.f32 0.3989423, %v1843_v33 }
 0x9a6   : > { %v1867_v37 = vmul.f32 %v1863_v34, %v4271_v60  ;;  %v2496_v38 = vsel %vm848_vm1, %v2495_v35, 0.0 }
 0x9a7   : > { %2497 = vadd.xlane.f32.xlu1 %v2496_v38  ;;  %v1850_v39 = vpop.permute.xlu1 %1849 }
 0x9a8   : > { %v1872_v40 = vmul.f32 1.442695, %v1867_v37  ;;  %v1864_v47 = vmul.f32 %v1850_v39, %v1850_v39  ;;  %v1860_v50 = vmul.f32 0.3989423, %v1850_v39 }
 0x9aa   : > { %3269 = vpow2.f32 %v1872_v40  ;;  %v1868_v43 = vmul.f32 %v1864_v47, %v4271_v60 }
 0x9ac   : > { %v1874_v44 = vmul.f32 1.442695, %v1868_v43 }
 0x9ae   : > { %3271 = vpow2.f32 %v1874_v44 }
 0x9b7   : > { %v3270_v48 = vpop.eup %3269 }
 0x9b8   : > { %v1879_v49 = vmul.f32 %v3270_v48, %v1859_v45  ;;  %1856 = vbcast.lane.b32.xlu1 %v1854_v46, 256 }
 0x9ba   : > { %1883 = vst.msk [vmem:[%s4276_s1 + $0x8] sm:$0xff] %vm1490_vm3, %v1879_v49 }
 0x9bb   : > { %v3272_v51 = vpop.eup %3271 }
 0x9bc   : > { %v1880_v52 = vmul.f32 %v3272_v51, %v1860_v50 }
 0x9be   : > { %1884 = vst.msk [vmem:[%s4276_s1 + $0x10] sm:$0xff] %vm1490_vm3, %v1880_v52 }
 0x9bf   : > { %3550 = shalt.err (!%p3547_p11)
}
 0x9c0   : > { %s3551_s0 = scalar_lea.hbm %s4323_s23, 512  ;;  %s3555_s6 = scalar_lea.hbm %s4473_s20, 1024 }
 0x9c1   : > { %p3552_p5 = scmp.ne.s32.totalorder %s4323_s23, %s3551_s0  ;;  %p3556_p4 = scmp.lt.s32.totalorder %s4323_s23, %s4473_s20 }
 0x9c2   : > { %p3557_p8 = scmp.lt.s32.totalorder %s3555_s6, %s3551_s0 }
 0x9c3   : > { %p3553_p6 = pnand %p3552_p5, %p4546_p12 }
 0x9c4   : > { %p3558_p10 = por %p3557_p8, %p3556_p4 }
 0x9c5   : > { %p3554_p7 = pneg %p3553_p6 }
 0x9c7   : > { %p3559_p9 = pnand %p3558_p10, %p3554_p7 }
 0x9c9   : > { %3562 = shalt.err (!%p3559_p9)
}
 0x9ca   : > { %s4493_s10 = smov 128   ;;  %s4547_s24 = smov 8   ;;  %v2887_v62 = vld [vmem:[%s4470_s17] ss:$0 sm:$0xff] }
 0x9cb   : > { %3085 = dma.vmem_to_hbm [thread:$0]  (%p4546_p12), %s4326_s26, 512, %s4323_s23, %s4328_s3, %s4493_s10, %s4493_s10, %s4547_s24  }
 0x9cc   : > { %s2835_s19 = sshll.u32 %s4192_s30, 3  ;;  %v2888_v59 = vld [vmem:[%s4471_s18] ss:$0 sm:$0xff]  ;;  %s2892_s28 = sshll.u32 %s3685_s27, 7 }
 0x9cd   : > { %s799_s21 = scalar_lea.vmem [#allocation21], %s2835_s19  ;;  %s2574_s29 = sshll.u32 %s4276_s1, 4  ;;  %s4372_s29 = int_to_ptr.vmem [resolvable:$true] %s2574_s29 }
 0x9ce   : > { %s2543_s6 = sshll.u32 %s799_s21, 4  ;;  %s4548_s2 = sld [smem:[#allocation52_spill]]  ;;  %s4370_s6 = int_to_ptr.vmem [resolvable:$true] %s2543_s6 }
 0x9cf   : > { %s4550_s19 = sshll.u32 %s3685_s27, 9  ;;  %s4551_s8 = sld [smem:[#allocation53_spill]] }
 0x9d0   : > { %s2519_s4 = scalar_lea.sflag [#allocation6], %s4192_s30  ;;  %s3563_s10 = scalar_lea.vmem %s4370_s6, 128 }
 0x9d1   : > { %p3564_p0 = scmp.ne.s32.totalorder %s4370_s6, %s3563_s10 }
 0x9d3   : > { %p3565_p1 = pnand %p3564_p0, %p4546_p12 }
 0x9d4   : > { %s4549_s0 = smov %s4548_s2  ;;  %s4368_s7 = scalar_lea.hbm %s4548_s2, %s2892_s28 }
 0x9d5   : > { %s4379_s9 = scalar_lea.hbm %s4551_s8, %s4550_s19  ;;  %p3566_p2 = pneg %p3565_p1 }
 0x9d6   : > { %s3720_s28 = smov [#allocation21]  }
 0x9d7   : > { %s3567_s2 = sshll.u32 %s3720_s28, 4  ;;  %s3568_s2 = int_to_ptr.vmem [resolvable:$false] %s3567_s2 }
 0x9d8   : > { %s3569_s11 = scalar_lea.vmem %s3568_s2, 256  ;;  %p3570_p3 = scmp.lt.s32.totalorder %s4370_s6, %s3568_s2 }
 0x9d9   : > { %p3571_p13 = scmp.lt.s32.totalorder %s3569_s11, %s3563_s10 }
 0x9db   : > { %p3572_p11 = por %p3571_p13, %p3570_p3 }
 0x9dd   : > { %p3573_p5 = pnand %p3572_p11, %p3566_p2 }
 0xa30   : > { %v2498_v32 = vpop.xlane.xlu1 %2497 }
 0xa31   : > { %v2499_v41 = vmul.f32 0.03125, %v2498_v32 }
 0xa33   : > { %v2500_v53 = vadd.f32 1e-05, %v2499_v41 }
 0xa34   : > { %v1857_v54 = vpop.permute.xlu1 %1856 }
 0xa35   : > { %3273 = vrsqrt.f32 %v2500_v53  ;;  %v1865_v55 = vmul.f32 %v1857_v54, %v1857_v54  ;;  %v1861_v63 = vmul.f32 0.3989423, %v1857_v54 }
 0xa37   : > { %v1869_v56 = vmul.f32 %v1865_v55, %v4271_v60 }
 0xa39   : > { %v1876_v58 = vmul.f32 1.442695, %v1869_v56 }
 0xa3b   : > { %3275 = vpow2.f32 %v1876_v58 }
 0xa42   : > { %v3274_v61 = vpop.eup %3273 }
 0xa43   : > { %v2502_v57 = vmul.f32 %v3274_v61, %v4303_v31 }
 0xa45   : > { %v2509_v60 = vmul.f32 %v2887_v62, %v2502_v57 }
 0xa47   : > { %v2516_v1 = vadd.f32 %v2888_v59, %v2509_v60 }
 0xa48   : > { %v3276_v36 = vpop.eup %3275 }
 0xa49   : > { %v1881_v28 = vmul.f32 %v3276_v36, %v1861_v63  ;;  %2517 = vst.msk [vmem:[%s799_s21] sm:$0xff] %vm848_vm1, %v2516_v1 }
 0xa4a   : > { %3576 = shalt.err (!%p3573_p5)
}
 0xa4b   : > { %s3577_s27 = scalar_lea.hbm %s4368_s7, 128  ;;  %s3581_s19 = scalar_lea.hbm %s4549_s0, 256 }
 0xa4c   : > { %p3578_p6 = scmp.ne.s32.totalorder %s4368_s7, %s3577_s27  ;;  %p3582_p8 = scmp.lt.s32.totalorder %s4368_s7, %s4549_s0 }
 0xa4d   : > { %p3583_p10 = scmp.lt.s32.totalorder %s3581_s19, %s3577_s27 }
 0xa4e   : > { %p3579_p7 = pnand %p3578_p6, %p4546_p12 }
 0xa4f   : > { %p3584_p9 = por %p3583_p10, %p3582_p8 }
 0xa50   : > { %p3580_p4 = pneg %p3579_p7 }
 0xa52   : > { %p3585_p0 = pnand %p3584_p9, %p3580_p4 }
 0xa54   : > { %3588 = shalt.err (!%p3585_p0)
}
 0xa55   : > { %3084 = dma.vmem_to_hbm [thread:$0]  (%p4546_p12), %s4370_s6, 128, %s4368_s7, %s2519_s4   ;;  %1885 = vst.msk [vmem:[%s4276_s1 + $0x18] sm:$0xff] %vm1490_vm3, %v1881_v28 }
 0xa56   : > { %s3589_s11 = scalar_lea.vmem %s4372_s29, 512  ;;  %s3721_s10 = smov [#allocation24]  }
 0xa57   : > { %p3590_p1 = scmp.ne.s32.totalorder %s4372_s29, %s3589_s11  ;;  %s3593_s28 = sshll.u32 %s3721_s10, 4  ;;  %s3594_s28 = int_to_ptr.vmem [resolvable:$false] %s3593_s28 }
 0xa58   : > { %s3595_s2 = scalar_lea.vmem %s3594_s28, 1024  ;;  %p3596_p13 = scmp.lt.s32.totalorder %s4372_s29, %s3594_s28 }
 0xa59   : > { %p3591_p2 = pnand %p3590_p1, %p4546_p12  ;;  %p3597_p11 = scmp.lt.s32.totalorder %s3595_s2, %s3589_s11 }
 0xa5b   : > { %p3592_p3 = pneg %p3591_p2  ;;  %p3598_p5 = por %p3597_p11, %p3596_p13 }
 0xa5d   : > { %p3599_p6 = pnand %p3598_p5, %p3592_p3 }
 0xa5f   : > { %3602 = shalt.err (!%p3599_p6)
}
 0xa60   : > { %s3603_s7 = scalar_lea.hbm %s4379_s9, 512  ;;  %s3607_s4 = scalar_lea.hbm %s4551_s8, 1024 }
 0xa61   : > { %p3604_p7 = scmp.ne.s32.totalorder %s4379_s9, %s3603_s7  ;;  %p3608_p10 = scmp.lt.s32.totalorder %s4379_s9, %s4551_s8 }
 0xa62   : > { %p3609_p9 = scmp.lt.s32.totalorder %s3607_s4, %s3603_s7 }
 0xa63   : > { %p3605_p4 = pnand %p3604_p7, %p4546_p12 }
 0xa64   : > { %p3610_p0 = por %p3609_p9, %p3608_p10 }
 0xa65   : > { %p3606_p8 = pneg %p3605_p4 }
 0xa67   : > { %p3611_p1 = pnand %p3610_p0, %p3606_p8 }
 0xa69   : > { %3614 = shalt.err (!%p3611_p1)
}
 0xa6a   : > { %s4552_s21 = smov 128  }
 0xa6b   : > { %3086 = dma.vmem_to_hbm [thread:$0]  (%p4546_p12), %s4372_s29, 512, %s4379_s9, %s4328_s3, %s4552_s21, %s4552_s21, %s4547_s24  }
 0xa6c PF: > { %s4553_s19 = sld [smem:[#allocation36_spill]] }
 0xa6d   : > { %s4554_s23 = sld [smem:[#allocation33_spill]] }
 0xa6e   : > { %s4555_s26 = sld [smem:[#allocation38_spill]] }
 0xa72   : > { %p3151_p2 = scmp.ge.s32.totalorder %s4553_s19, 2 }
 0xa73   : > { %s2589_s11 = sand.u32 1, %s4554_s23  }
 0xa74   : > { %p4556_p3 = scmp.ne.s32.totalorder %s4555_s26, 0  ;;  %s2590_s10 = scalar_lea.sflag [#allocation6], %s2589_s11 }
 0xa76   : > { %p3122_p13 = pnand %p3151_p2, %p4556_p3 }
 0xa78   : > { %p3123_p11 = pneg %p3122_p13 }
 0xa7a   : > { %3664 = dma.done.wait (%p3123_p11), %s2590_s10, 128  }
 0xa7b   : > { %3666 = vsyncadd (%p3123_p11), %s2590_s10, 4294967168  ;;  %s4557_s5 = sadd.s32 4294967294, %s4553_s19  }
 0xa7c   : > { %s2598_s28 = sand.u32 1, %s4557_s5  }
 0xa7d   : > { %s2599_s2 = scalar_lea.sflag [#allocation23], %s2598_s28 }
 0xa7e   : > { %3668 = dma.done.wait (%p3123_p11), %s2599_s2, 1024  }
 0xa7f   : > { %3670 = vsyncadd (%p3123_p11), %s2599_s2, 4294966272  ;;  %s44_s28 = sadd.s32 1, %s4553_s19   ;;  %s4558_s9 = sld [smem:[#allocation34_spill]] }
 0xa80   : > { %p41_p12 = scmp.ge.s32.totalorder %s44_s28, 4   ;;  %s4559_s26 = sld [smem:[#allocation39_spill]] }
 0xa81   : > { %s4560_s27 = sld [smem:[#allocation35_spill]]  ;;  %s4562_s2 = smov %s3677_s25 }
 0xa82   : > { %s4561_s3 = sld [smem:[#allocation37_spill]]  ;;  %43 = sbr.rel (!%p41_p12) target bundleno = 27 (0x1b), region = 209 }
 0xa85   : > { %s4563_s25 = smov %s4558_s9 }
 0xa87   :  { %2613 = vsyncpa [#allocation5], 1 }
 0xa88   :  { %2615 = vsyncpa [#allocation5 + $0x1], 1 }
 0xa89   :  { %2616 = vsyncpa [#allocation8], 1 }
 0xa8a   :  { %2617 = vsyncpa [#allocation11], 1 }
 0xa8b   :  { %2618 = vsyncpa [#allocation14], 1 }
 0xa8c   :  { %2619 = vsyncpa [#allocation17], 1 }
 0xa8d   :  { %2620 = vsyncpa [#allocation20], 1 }
 0xa8e   :  { %2621 = vsyncpa [#allocation6], 1 }
 0xa8f   :  { %2623 = vsyncpa [#allocation6 + $0x1], 1 }
 0xa90   :  { %2624 = vsyncpa [#allocation23], 1 }
 0xa91   :  { %2626 = vsyncpa [#allocation23 + $0x1], 1 }

</bundles_post_ra>
